<compile_context>
chip_gen: v5e
topology: v5e:2x2
jax: 0.10.0
libtpu: 0.0.40
codegen_flags: <defaults>
</compile_context>

<pallas_src>
import math

import jax
import jax.numpy as jnp
from jax import lax
from jax.experimental import pallas as pl
from jax.experimental.pallas import tpu as pltpu

EPS = 1e-5
GN_GROUPS = 32
FF_CHUNKS = 4          # FF hidden (4E) processed in FF_CHUNKS column blocks
FLASH_T = 256          # above this seq length use flash-style q/k tiling
FLASH_TQ = 256
FLASH_TK = 256

# Row layout of the packed (N_VEC, E) small-vector parameter array.
(FF1_LN_W, FF1_LN_B, FF1_B2,
 ATT_LN_W, ATT_LN_B,
 CV_LN_W, CV_LN_B, CV_WD0, CV_WD1, CV_WD2, CV_GN_W, CV_GN_B, CV_BP2,
 FF2_LN_W, FF2_LN_B, FF2_B2,
 FIN_LN_W, FIN_LN_B) = range(18)
N_VEC = 18


def _supports_buffered_blockspec():
    """One-time feature probe for BlockSpec(pipeline_mode=pl.Buffered(n))."""
    if not hasattr(pl, "Buffered"):
        return False
    try:
        pl.BlockSpec((8, 128), lambda b: (0, 0), pipeline_mode=pl.Buffered(1))
        return True
    except (TypeError, ValueError):
        return False


_HAS_BUFFERED = _supports_buffered_blockspec()


def _vmem_limit_bytes():
    # Generation-aware VMEM budget: ~75% of physical capacity, capped at
    # 100 MiB (v5e/v6e: 128 MiB -> 96 MiB; v7x: 64 MiB -> 48 MiB).
    try:  # narrow hardware-info probe only; never hides kernel/compile errors
        cap = int(getattr(pltpu.get_tpu_info(), "vmem_capacity_bytes", 64 << 20))
    except Exception:
        cap = 64 << 20
    return max(32 << 20, min(cap * 3 // 4, 100 << 20))


def _make_kernel(names, T, E, H):
    hd = E // H
    half = hd // 2
    scale = 1.0 / math.sqrt(hd)
    bf16 = jnp.bfloat16
    f32 = jnp.float32
    NT = (((1,), (1,)), ((), ()))   # contract dim 1 of q with dim 1 of k (q @ k^T)

    def kernel(x_ref, *refs):
        o_ref = refs[-1]
        R = dict(zip(names, refs[:-1]))   # name -> Ref; read at point of use
        vecs_ref = R['vecs']

        def vec(i):                       # (1, E) f32 row of packed small vectors
            return vecs_ref[i:i + 1, :]

        def layer_norm(z, wi, bi):        # stats in f32
            mu = jnp.mean(z, axis=-1, keepdims=True)
            var = jnp.mean((z - mu) ** 2, axis=-1, keepdims=True)
            return (z - mu) * lax.rsqrt(var + EPS) * vec(wi) + vec(bi)

        def silu(z):
            return z * jax.nn.sigmoid(z)

        x = x_ref[0]                      # (T, E) f32

        # ---- FeedForward: x + (LN -> Linear(E,4E) -> SiLU -> Linear(4E,E)) --
        # Hidden dim processed in FF_CHUNKS column blocks of W1 / row blocks of
        # W2 so the full (T, 4E) hidden never materializes.
        def ff(x, pre, lnw, lnb, b2i):
            z = layer_norm(x, lnw, lnb).astype(bf16)
            w1 = R[pre + 'W1'][...]       # (E, 4E) bf16
            b1 = R[pre + 'b1'][...]       # (1, 4E) f32
            w2 = R[pre + 'W2'][...]       # (4E, E) bf16
            cw = (4 * E) // FF_CHUNKS
            acc = jnp.zeros((T, E), f32)
            for c in range(FF_CHUNKS):
                c0, c1 = c * cw, (c + 1) * cw
                h = jnp.dot(z, w1[:, c0:c1], preferred_element_type=f32) + b1[:, c0:c1]
                h = silu(h).astype(bf16)  # (T, cw) bf16 chunk
                acc = acc + jnp.dot(h, w2[c0:c1, :], preferred_element_type=f32)
            return x + acc + vec(b2i)

        # ---- Attention: x + (LN -> MHSA with RoPE -> output proj) -----------
        def attend(q, k, v):              # bf16 (T, hd) each -> f32 (T, hd)
            if T <= FLASH_T:
                s = lax.dot_general(q, k, NT, preferred_element_type=f32) * scale
                s = s - jnp.max(s, axis=-1, keepdims=True)
                p = jnp.exp(s)
                l = jnp.sum(p, axis=-1, keepdims=True)
                return jnp.dot(p.astype(bf16), v, preferred_element_type=f32) / l
            # Flash-style online softmax: working set bounded by (TQ, TK).
            blocks = []
            for q0 in range(0, T, FLASH_TQ):
                qc = q[q0:q0 + FLASH_TQ]
                tq = qc.shape[0]
                m = jnp.full((tq, 1), -jnp.inf, f32)
                l = jnp.zeros((tq, 1), f32)
                acc = jnp.zeros((tq, hd), f32)
                for k0 in range(0, T, FLASH_TK):
                    kc = k[k0:k0 + FLASH_TK]
                    vc = v[k0:k0 + FLASH_TK]
                    s = lax.dot_general(qc, kc, NT, preferred_element_type=f32) * scale
                    m_new = jnp.maximum(m, jnp.max(s, axis=-1, keepdims=True))
                    a = jnp.exp(m - m_new)
                    p = jnp.exp(s - m_new)
                    l = a * l + jnp.sum(p, axis=-1, keepdims=True)
                    acc = a * acc + jnp.dot(p.astype(bf16), vc,
                                            preferred_element_type=f32)
                    m = m_new
                blocks.append(acc / l)
            return jnp.concatenate(blocks, axis=0)

        def attn(x):
            # TODO(synk): attention mask is not supported (mask=None path only).
            z = layer_norm(x, ATT_LN_W, ATT_LN_B).astype(bf16)
            # Fused QKV: one (T,E)@(E,3E) matmul, activations kept bf16.
            qkv = jnp.dot(z, R['att_Wqkv'][...],
                          preferred_element_type=f32).astype(bf16)   # (T, 3E)
            cos = R['rope_cos'][...]          # (T, hd) de-interleaved layout
            sin = R['rope_sin_signed'][...]   # (T, hd) sign folded into sin
            wo = R['att_Wo'][...]             # (E, E) bf16

            def rope(u):
                # q/k weight columns were de-interleaved host-side (NeoX
                # layout), so rotate_half == lane roll by hd//2 (XLU).
                uf = u.astype(f32)
                return (uf * cos + pltpu.roll(uf, shift=half, axis=1) * sin).astype(bf16)

            o = jnp.zeros((T, E), f32)
            for h in range(H):
                q = rope(qkv[:, h * hd:(h + 1) * hd])
                k = rope(qkv[:, E + h * hd:E + (h + 1) * hd])
                v = qkv[:, 2 * E + h * hd:2 * E + (h + 1) * hd]
                head = attend(q, k, v)        # (T, hd) f32
                # Per-head partial output projection; no head concatenation.
                o = o + jnp.dot(head.astype(bf16), wo[h * hd:(h + 1) * hd, :],
                                preferred_element_type=f32)
            return x + o

        # ---- Convolution module ---------------------------------------------
        def conv(x):
            z = layer_norm(x, CV_LN_W, CV_LN_B).astype(bf16)
            # Fused pointwise Conv1d(E, 2E, k=1) + GLU: one (T,E)@(E,2E) matmul.
            pw = jnp.dot(z, R['cv_Wp1'][...],
                         preferred_element_type=f32) + R['cv_bp1'][...]   # (T, 2E)
            g = pw[:, :E] * jax.nn.sigmoid(pw[:, E:])                     # (T, E) f32
            # Depthwise Conv1d(E, E, k=3, pad=1, groups=E, no bias) via XLU
            # sublane rolls + edge masks (jnp.roll semantics: roll(+1) brings
            # g[t-1] to row t).
            t = lax.broadcasted_iota(jnp.int32, (T, 1), 0)
            not_first = (t > 0).astype(f32)
            not_last = (t < T - 1).astype(f32)
            zp = pltpu.roll(g, shift=1, axis=0) * not_first               # g[t-1]
            zn = pltpu.roll(g, shift=T - 1, axis=0) * not_last            # g[t+1]
            d = zp * vec(CV_WD0) + g * vec(CV_WD1) + zn * vec(CV_WD2)
            d = silu(d)
            # GroupNorm(32, E): two-pass f32 stats via precomputed 0/1 group
            # aggregation matrix (each channel gets its group's sum).
            agg = R['cv_gn_agg'][...]
            inv_n = 1.0 / float((E // GN_GROUPS) * T)
            mean = jnp.dot(jnp.sum(d, axis=0, keepdims=True), agg,
                           preferred_element_type=f32) * inv_n            # (1, E)
            c = d - mean
            var = jnp.dot(jnp.sum(c * c, axis=0, keepdims=True), agg,
                          preferred_element_type=f32) * inv_n
            d = c * lax.rsqrt(var + EPS) * vec(CV_GN_W) + vec(CV_GN_B)
            # Pointwise Conv1d(E, E, k=1).
            d = jnp.dot(d.astype(bf16), R['cv_Wp2'][...],
                        preferred_element_type=f32) + vec(CV_BP2)
            return x + d

        # ConformerBlock.forward: each sub-block already returns x + F(x) and
        # the block adds the input again (double residual, exactly as in the
        # reference PyTorch code).
        x = x + ff(x, 'ff1_', FF1_LN_W, FF1_LN_B, FF1_B2)
        x = x + attn(x)
        x = x + conv(x)
        x = x + ff(x, 'ff2_', FF2_LN_W, FF2_LN_B, FF2_B2)
        x = layer_norm(x, FIN_LN_W, FIN_LN_B)
        o_ref[0] = x.astype(o_ref.dtype)

    return kernel


def conformer_block(x, params, *, T, E, H):
    B = x.shape[0]
    names = list(params.keys())
    vals = [params[n] for n in names]
    kernel = _make_kernel(names, T, E, H)

    # Rough cost hint so XLA can schedule/overlap around the custom call.
    flops = B * (46 * T * E * E + 4 * T * T * E)
    transc = B * (H * T * T + 8 * T * E)
    bytes_acc = 2 * B * T * E * 4 + sum(int(v.size) * v.dtype.itemsize for v in vals)

    # Weights are constant across the grid: single-buffer them (halves their
    # VMEM footprint); x / output keep default double-buffering.
    w_kwargs = {"pipeline_mode": pl.Buffered(1)} if _HAS_BUFFERED else {}
    in_specs = [pl.BlockSpec((1, T, E), lambda b: (b, 0, 0))]
    for v in vals:  # all params are 2D and grid-invariant
        in_specs.append(pl.BlockSpec(v.shape, lambda b: (0, 0), **w_kwargs))
    out_spec = pl.BlockSpec((1, T, E), lambda b: (b, 0, 0))

    # TODO(synk): when B == 1 on v7x (2 TensorCores) add a second "parallel"
    # grid axis (e.g. over q-tiles / head groups) so both cores are used.
    return pl.pallas_call(
        kernel,
        out_shape=jax.ShapeDtypeStruct((B, T, E), jnp.float32),
        grid_spec=pltpu.PrefetchScalarGridSpec(
            num_scalar_prefetch=0,
            grid=(B,),
            in_specs=in_specs,
            out_specs=out_spec,
        ),
        compiler_params=pltpu.CompilerParams(
            dimension_semantics=("parallel",),        # batch is independent
            vmem_limit_bytes=_vmem_limit_bytes(),     # generation-aware budget
        ),
        cost_estimate=pl.CostEstimate(
            flops=flops, transcendentals=transc, bytes_accessed=bytes_acc),
    )(x, *vals)


def _deinterleave_perm(E, H, hd):
    # Per head: interleaved RoPE pairs (x0,x1,x2,x3,...) -> [evens | odds].
    idx = []
    for h in range(H):
        base = h * hd
        idx.extend(base + j for j in range(0, hd, 2))
        idx.extend(base + j for j in range(1, hd, 2))
    return jnp.asarray(idx, dtype=jnp.int32)


def init_params(key, *, T, E, H):
    hd = E // H
    assert E % H == 0 and hd % 2 == 0 and E % GN_GROUPS == 0
    assert (4 * E) % FF_CHUNKS == 0
    # NOTE: for best MXU utilization pick E (and ideally hd) as multiples of
    # 128 in real configs; small shapes here are only for the smoke test.
    keys = iter(jax.random.split(key, 64))
    bf = jnp.bfloat16

    def nrm(shape, dtype=jnp.float32, scale=0.05):
        return (scale * jax.random.normal(next(keys), shape)).astype(dtype)

    ones = lambda: jnp.ones((E,), jnp.float32)
    zeros = lambda: jnp.zeros((E,), jnp.float32)

    p = {}
    vec_rows = [None] * N_VEC

    # FeedForward blocks (matmul weights in bf16).
    for pre, lnw, lnb, b2 in (('ff1_', FF1_LN_W, FF1_LN_B, FF1_B2),
                              ('ff2_', FF2_LN_W, FF2_LN_B, FF2_B2)):
        vec_rows[lnw] = ones()
        vec_rows[lnb] = zeros()
        p[pre + 'W1'] = nrm((E, 4 * E), bf)
        p[pre + 'b1'] = nrm((1, 4 * E))
        p[pre + 'W2'] = nrm((4 * E, E), bf)
        vec_rows[b2] = nrm((E,))

    # Attention: fused QKV weight (E, 3E), no bias (matches the reference).
    # q/k column blocks are permuted per head from interleaved RoPE pairs to
    # [evens | odds] so rotate_half becomes a lane roll by hd//2 in-kernel.
    vec_rows[ATT_LN_W] = ones()
    vec_rows[ATT_LN_B] = zeros()
    wq, wk, wv = nrm((E, E)), nrm((E, E)), nrm((E, E))
    perm = _deinterleave_perm(E, H, hd)
    p['att_Wqkv'] = jnp.concatenate(
        [jnp.take(wq, perm, axis=1), jnp.take(wk, perm, axis=1), wv],
        axis=1).astype(bf)
    p['att_Wo'] = nrm((E, E), bf)

    # RoPE tables in the de-interleaved layout (per head: [evens | odds]).
    exponent = jnp.arange(0, hd, 2, dtype=jnp.float32) / hd
    theta = 1.0 / jnp.power(10000.0, exponent)                    # (hd/2,)
    enc = jnp.arange(T, dtype=jnp.float32)[:, None] * theta[None, :]
    cos_h, sin_h = jnp.cos(enc), jnp.sin(enc)                     # (T, hd/2)
    p['rope_cos'] = jnp.concatenate([cos_h, cos_h], axis=1).astype(jnp.float32)
    p['rope_sin_signed'] = jnp.concatenate([-sin_h, sin_h], axis=1).astype(jnp.float32)

    # Convolution block.
    vec_rows[CV_LN_W] = ones()
    vec_rows[CV_LN_B] = zeros()
    p['cv_Wp1'] = nrm((E, 2 * E), bf)     # fused Conv1d(E,2E,1): [value | gate]
    p['cv_bp1'] = nrm((1, 2 * E))
    wd = nrm((3, E))                      # depthwise taps [t-1, t, t+1] per channel
    vec_rows[CV_WD0] = wd[0]
    vec_rows[CV_WD1] = wd[1]
    vec_rows[CV_WD2] = wd[2]
    vec_rows[CV_GN_W] = ones()
    vec_rows[CV_GN_B] = zeros()
    g = jnp.arange(E) // (E // GN_GROUPS)
    p['cv_gn_agg'] = (g[:, None] == g[None, :]).astype(jnp.float32)  # host-side
    p['cv_Wp2'] = nrm((E, E), bf)
    vec_rows[CV_BP2] = nrm((E,))

    # Final LayerNorm.
    vec_rows[FIN_LN_W] = ones()
    vec_rows[FIN_LN_B] = zeros()

    # All (1, E)-shaped vectors packed into one array -> one BlockSpec / DMA.
    p['vecs'] = jnp.stack(vec_rows, axis=0)   # (N_VEC, E) f32
    return p


if __name__ == "__main__":
    B, T, E, H = 2, 8, 32, 4   # E must be a multiple of 32 (GroupNorm) and of H
    key = jax.random.PRNGKey(0)
    kx, kp = jax.random.split(key)
    x = jax.random.normal(kx, (B, T, E), dtype=jnp.float32)
    params = init_params(kp, T=T, E=E, H=H)

    out = jax.block_until_ready(conformer_block(x, params, T=T, E=E, H=H))

    assert out.shape == (B, T, E)
    assert bool(jnp.all(jnp.isfinite(out)))
    print("KERNEL_OK")
</pallas_src>

<mosaic_0001>
module attributes {stable_mosaic.version = 11 : i64} {
  func.func @kernel(%arg0: i32, %arg1: memref<1x8x32xf32, #tpu.memory_space<vmem>>, %arg2: memref<32x128xbf16, #tpu.memory_space<vmem>>, %arg3: memref<1x128xf32, #tpu.memory_space<vmem>>, %arg4: memref<128x32xbf16, #tpu.memory_space<vmem>>, %arg5: memref<32x128xbf16, #tpu.memory_space<vmem>>, %arg6: memref<1x128xf32, #tpu.memory_space<vmem>>, %arg7: memref<128x32xbf16, #tpu.memory_space<vmem>>, %arg8: memref<32x96xbf16, #tpu.memory_space<vmem>>, %arg9: memref<32x32xbf16, #tpu.memory_space<vmem>>, %arg10: memref<8x8xf32, #tpu.memory_space<vmem>>, %arg11: memref<8x8xf32, #tpu.memory_space<vmem>>, %arg12: memref<32x64xbf16, #tpu.memory_space<vmem>>, %arg13: memref<1x64xf32, #tpu.memory_space<vmem>>, %arg14: memref<32x32xf32, #tpu.memory_space<vmem>>, %arg15: memref<32x32xbf16, #tpu.memory_space<vmem>>, %arg16: memref<18x32xf32, #tpu.memory_space<vmem>>, %arg17: memref<1x8x32xf32, #tpu.memory_space<vmem>>) attributes {dimension_semantics = [#tpu.dimension_semantics<parallel>], iteration_bounds = array<i64: 2>, scalar_prefetch = 0 : i64, scratch_operands = 0 : i64, tpu.core_type = #tpu.core_type<tc>, window_params = [{transform_indices = @transform_0, window_bounds = array<i64: 1, 8, 32>}, {pipeline_mode = #tpu.pipeline_mode<synchronous>, transform_indices = @transform_1, window_bounds = array<i64: 32, 128>}, {pipeline_mode = #tpu.pipeline_mode<synchronous>, transform_indices = @transform_2, window_bounds = array<i64: 1, 128>}, {pipeline_mode = #tpu.pipeline_mode<synchronous>, transform_indices = @transform_3, window_bounds = array<i64: 128, 32>}, {pipeline_mode = #tpu.pipeline_mode<synchronous>, transform_indices = @transform_4, window_bounds = array<i64: 32, 128>}, {pipeline_mode = #tpu.pipeline_mode<synchronous>, transform_indices = @transform_5, window_bounds = array<i64: 1, 128>}, {pipeline_mode = #tpu.pipeline_mode<synchronous>, transform_indices = @transform_6, window_bounds = array<i64: 128, 32>}, {pipeline_mode = #tpu.pipeline_mode<synchronous>, transform_indices = @transform_7, window_bounds = array<i64: 32, 96>}, {pipeline_mode = #tpu.pipeline_mode<synchronous>, transform_indices = @transform_8, window_bounds = array<i64: 32, 32>}, {pipeline_mode = #tpu.pipeline_mode<synchronous>, transform_indices = @transform_9, window_bounds = array<i64: 8, 8>}, {pipeline_mode = #tpu.pipeline_mode<synchronous>, transform_indices = @transform_10, window_bounds = array<i64: 8, 8>}, {pipeline_mode = #tpu.pipeline_mode<synchronous>, transform_indices = @transform_11, window_bounds = array<i64: 32, 64>}, {pipeline_mode = #tpu.pipeline_mode<synchronous>, transform_indices = @transform_12, window_bounds = array<i64: 1, 64>}, {pipeline_mode = #tpu.pipeline_mode<synchronous>, transform_indices = @transform_13, window_bounds = array<i64: 32, 32>}, {pipeline_mode = #tpu.pipeline_mode<synchronous>, transform_indices = @transform_14, window_bounds = array<i64: 32, 32>}, {pipeline_mode = #tpu.pipeline_mode<synchronous>, transform_indices = @transform_15, window_bounds = array<i64: 18, 32>}, {transform_indices = @transform_16, window_bounds = array<i64: 1, 8, 32>}]} {
    %c0 = arith.constant 0 : index
    %c0_0 = arith.constant 0 : index
    %c0_1 = arith.constant 0 : index
    %0 = vector.load %arg1[%c0, %c0_0, %c0_1] : memref<1x8x32xf32, #tpu.memory_space<vmem>>, vector<1x8x32xf32>
    %1 = vector.shape_cast %0 : vector<1x8x32xf32> to vector<8x32xf32>
    %cst = arith.constant dense<0.000000e+00> : vector<8xf32>
    %2 = vector.multi_reduction <add>, %1, %cst [1] : vector<8x32xf32> to vector<8xf32>
    %3 = vector.shape_cast %2 : vector<8xf32> to vector<8x1xf32>
    %cst_2 = arith.constant 3.200000e+01 : f32
    %4 = vector.broadcast %cst_2 : f32 to vector<8x1xf32>
    %5 = arith.divf %3, %4 : vector<8x1xf32>
    %6 = vector.broadcast %5 : vector<8x1xf32> to vector<8x32xf32>
    %7 = arith.subf %1, %6 : vector<8x32xf32>
    %8 = arith.mulf %7, %7 : vector<8x32xf32>
    %cst_3 = arith.constant dense<0.000000e+00> : vector<8xf32>
    %9 = vector.multi_reduction <add>, %8, %cst_3 [1] : vector<8x32xf32> to vector<8xf32>
    %10 = vector.shape_cast %9 : vector<8xf32> to vector<8x1xf32>
    %cst_4 = arith.constant 3.200000e+01 : f32
    %11 = vector.broadcast %cst_4 : f32 to vector<8x1xf32>
    %12 = arith.divf %10, %11 : vector<8x1xf32>
    %13 = vector.broadcast %5 : vector<8x1xf32> to vector<8x32xf32>
    %14 = arith.subf %1, %13 : vector<8x32xf32>
    %cst_5 = arith.constant 9.99999974E-6 : f32
    %15 = vector.broadcast %cst_5 : f32 to vector<8x1xf32>
    %16 = arith.addf %12, %15 : vector<8x1xf32>
    %17 = math.rsqrt %16 : vector<8x1xf32>
    %18 = vector.broadcast %17 : vector<8x1xf32> to vector<8x32xf32>
    %19 = arith.mulf %14, %18 : vector<8x32xf32>
    %c0_6 = arith.constant 0 : index
    %c0_7 = arith.constant 0 : index
    %20 = vector.load %arg16[%c0_6, %c0_7] : memref<18x32xf32, #tpu.memory_space<vmem>>, vector<1x32xf32>
    %21 = vector.broadcast %20 : vector<1x32xf32> to vector<8x32xf32>
    %22 = arith.mulf %19, %21 : vector<8x32xf32>
    %c1 = arith.constant 1 : index
    %c0_8 = arith.constant 0 : index
    %23 = vector.load %arg16[%c1, %c0_8] : memref<18x32xf32, #tpu.memory_space<vmem>>, vector<1x32xf32>
    %24 = vector.broadcast %23 : vector<1x32xf32> to vector<8x32xf32>
    %25 = arith.addf %22, %24 : vector<8x32xf32>
    %26 = arith.truncf %25 : vector<8x32xf32> to vector<8x32xbf16>
    %c0_9 = arith.constant 0 : index
    %c0_10 = arith.constant 0 : index
    %27 = vector.load %arg2[%c0_9, %c0_10] : memref<32x128xbf16, #tpu.memory_space<vmem>>, vector<32x128xbf16>
    %c0_11 = arith.constant 0 : index
    %c0_12 = arith.constant 0 : index
    %28 = vector.load %arg3[%c0_11, %c0_12] : memref<1x128xf32, #tpu.memory_space<vmem>>, vector<1x128xf32>
    %c0_13 = arith.constant 0 : index
    %c0_14 = arith.constant 0 : index
    %29 = vector.load %arg4[%c0_13, %c0_14] : memref<128x32xbf16, #tpu.memory_space<vmem>>, vector<128x32xbf16>
    %cst_15 = arith.constant 0.000000e+00 : f32
    %30 = vector.broadcast %cst_15 : f32 to vector<8x32xf32>
    %31 = vector.extract_strided_slice %27 {offsets = [0, 0], sizes = [32, 32], strides = [1, 1]} : vector<32x128xbf16> to vector<32x32xbf16>
    %cst_16 = arith.constant dense<0.000000e+00> : vector<8x32xf32>
    %32 = tpu.matmul %26, %31, %cst_16 {dimension_numbers = #tpu.dot_dimension_numbers<[1], [0], [0], [1], [0, 0, 1, 1], [], []>} : vector<8x32xbf16>, vector<32x32xbf16>, vector<8x32xf32> -> vector<8x32xf32>
    %33 = vector.extract_strided_slice %28 {offsets = [0, 0], sizes = [1, 32], strides = [1, 1]} : vector<1x128xf32> to vector<1x32xf32>
    %34 = vector.broadcast %33 : vector<1x32xf32> to vector<8x32xf32>
    %35 = arith.addf %32, %34 : vector<8x32xf32>
    %36 = arith.negf %35 : vector<8x32xf32>
    %37 = math.exp %36 : vector<8x32xf32>
    %cst_17 = arith.constant 1.000000e+00 : f32
    %38 = vector.broadcast %cst_17 : f32 to vector<8x32xf32>
    %39 = arith.addf %38, %37 : vector<8x32xf32>
    %40 = arith.divf %38, %39 : vector<8x32xf32>
    %41 = arith.mulf %35, %40 : vector<8x32xf32>
    %42 = arith.truncf %41 : vector<8x32xf32> to vector<8x32xbf16>
    %43 = vector.extract_strided_slice %29 {offsets = [0, 0], sizes = [32, 32], strides = [1, 1]} : vector<128x32xbf16> to vector<32x32xbf16>
    %cst_18 = arith.constant dense<0.000000e+00> : vector<8x32xf32>
    %44 = tpu.matmul %42, %43, %cst_18 {dimension_numbers = #tpu.dot_dimension_numbers<[1], [0], [0], [1], [0, 0, 1, 1], [], []>} : vector<8x32xbf16>, vector<32x32xbf16>, vector<8x32xf32> -> vector<8x32xf32>
    %45 = arith.addf %30, %44 : vector<8x32xf32>
    %46 = vector.extract_strided_slice %27 {offsets = [0, 32], sizes = [32, 32], strides = [1, 1]} : vector<32x128xbf16> to vector<32x32xbf16>
    %cst_19 = arith.constant dense<0.000000e+00> : vector<8x32xf32>
    %47 = tpu.matmul %26, %46, %cst_19 {dimension_numbers = #tpu.dot_dimension_numbers<[1], [0], [0], [1], [0, 0, 1, 1], [], []>} : vector<8x32xbf16>, vector<32x32xbf16>, vector<8x32xf32> -> vector<8x32xf32>
    %48 = vector.extract_strided_slice %28 {offsets = [0, 32], sizes = [1, 32], strides = [1, 1]} : vector<1x128xf32> to vector<1x32xf32>
    %49 = vector.broadcast %48 : vector<1x32xf32> to vector<8x32xf32>
    %50 = arith.addf %47, %49 : vector<8x32xf32>
    %51 = arith.negf %50 : vector<8x32xf32>
    %52 = math.exp %51 : vector<8x32xf32>
    %cst_20 = arith.constant 1.000000e+00 : f32
    %53 = vector.broadcast %cst_20 : f32 to vector<8x32xf32>
    %54 = arith.addf %53, %52 : vector<8x32xf32>
    %55 = arith.divf %53, %54 : vector<8x32xf32>
    %56 = arith.mulf %50, %55 : vector<8x32xf32>
    %57 = arith.truncf %56 : vector<8x32xf32> to vector<8x32xbf16>
    %58 = vector.extract_strided_slice %29 {offsets = [32, 0], sizes = [32, 32], strides = [1, 1]} : vector<128x32xbf16> to vector<32x32xbf16>
    %cst_21 = arith.constant dense<0.000000e+00> : vector<8x32xf32>
    %59 = tpu.matmul %57, %58, %cst_21 {dimension_numbers = #tpu.dot_dimension_numbers<[1], [0], [0], [1], [0, 0, 1, 1], [], []>} : vector<8x32xbf16>, vector<32x32xbf16>, vector<8x32xf32> -> vector<8x32xf32>
    %60 = arith.addf %45, %59 : vector<8x32xf32>
    %61 = vector.extract_strided_slice %27 {offsets = [0, 64], sizes = [32, 32], strides = [1, 1]} : vector<32x128xbf16> to vector<32x32xbf16>
    %cst_22 = arith.constant dense<0.000000e+00> : vector<8x32xf32>
    %62 = tpu.matmul %26, %61, %cst_22 {dimension_numbers = #tpu.dot_dimension_numbers<[1], [0], [0], [1], [0, 0, 1, 1], [], []>} : vector<8x32xbf16>, vector<32x32xbf16>, vector<8x32xf32> -> vector<8x32xf32>
    %63 = vector.extract_strided_slice %28 {offsets = [0, 64], sizes = [1, 32], strides = [1, 1]} : vector<1x128xf32> to vector<1x32xf32>
    %64 = vector.broadcast %63 : vector<1x32xf32> to vector<8x32xf32>
    %65 = arith.addf %62, %64 : vector<8x32xf32>
    %66 = arith.negf %65 : vector<8x32xf32>
    %67 = math.exp %66 : vector<8x32xf32>
    %cst_23 = arith.constant 1.000000e+00 : f32
    %68 = vector.broadcast %cst_23 : f32 to vector<8x32xf32>
    %69 = arith.addf %68, %67 : vector<8x32xf32>
    %70 = arith.divf %68, %69 : vector<8x32xf32>
    %71 = arith.mulf %65, %70 : vector<8x32xf32>
    %72 = arith.truncf %71 : vector<8x32xf32> to vector<8x32xbf16>
    %73 = vector.extract_strided_slice %29 {offsets = [64, 0], sizes = [32, 32], strides = [1, 1]} : vector<128x32xbf16> to vector<32x32xbf16>
    %cst_24 = arith.constant dense<0.000000e+00> : vector<8x32xf32>
    %74 = tpu.matmul %72, %73, %cst_24 {dimension_numbers = #tpu.dot_dimension_numbers<[1], [0], [0], [1], [0, 0, 1, 1], [], []>} : vector<8x32xbf16>, vector<32x32xbf16>, vector<8x32xf32> -> vector<8x32xf32>
    %75 = arith.addf %60, %74 : vector<8x32xf32>
    %76 = vector.extract_strided_slice %27 {offsets = [0, 96], sizes = [32, 32], strides = [1, 1]} : vector<32x128xbf16> to vector<32x32xbf16>
    %cst_25 = arith.constant dense<0.000000e+00> : vector<8x32xf32>
    %77 = tpu.matmul %26, %76, %cst_25 {dimension_numbers = #tpu.dot_dimension_numbers<[1], [0], [0], [1], [0, 0, 1, 1], [], []>} : vector<8x32xbf16>, vector<32x32xbf16>, vector<8x32xf32> -> vector<8x32xf32>
    %78 = vector.extract_strided_slice %28 {offsets = [0, 96], sizes = [1, 32], strides = [1, 1]} : vector<1x128xf32> to vector<1x32xf32>
    %79 = vector.broadcast %78 : vector<1x32xf32> to vector<8x32xf32>
    %80 = arith.addf %77, %79 : vector<8x32xf32>
    %81 = arith.negf %80 : vector<8x32xf32>
    %82 = math.exp %81 : vector<8x32xf32>
    %cst_26 = arith.constant 1.000000e+00 : f32
    %83 = vector.broadcast %cst_26 : f32 to vector<8x32xf32>
    %84 = arith.addf %83, %82 : vector<8x32xf32>
    %85 = arith.divf %83, %84 : vector<8x32xf32>
    %86 = arith.mulf %80, %85 : vector<8x32xf32>
    %87 = arith.truncf %86 : vector<8x32xf32> to vector<8x32xbf16>
    %88 = vector.extract_strided_slice %29 {offsets = [96, 0], sizes = [32, 32], strides = [1, 1]} : vector<128x32xbf16> to vector<32x32xbf16>
    %cst_27 = arith.constant dense<0.000000e+00> : vector<8x32xf32>
    %89 = tpu.matmul %87, %88, %cst_27 {dimension_numbers = #tpu.dot_dimension_numbers<[1], [0], [0], [1], [0, 0, 1, 1], [], []>} : vector<8x32xbf16>, vector<32x32xbf16>, vector<8x32xf32> -> vector<8x32xf32>
    %90 = arith.addf %75, %89 : vector<8x32xf32>
    %91 = arith.addf %1, %90 : vector<8x32xf32>
    %c2 = arith.constant 2 : index
    %c0_28 = arith.constant 0 : index
    %92 = vector.load %arg16[%c2, %c0_28] : memref<18x32xf32, #tpu.memory_space<vmem>>, vector<1x32xf32>
    %93 = vector.broadcast %92 : vector<1x32xf32> to vector<8x32xf32>
    %94 = arith.addf %91, %93 : vector<8x32xf32>
    %95 = arith.addf %1, %94 : vector<8x32xf32>
    %cst_29 = arith.constant dense<0.000000e+00> : vector<8xf32>
    %96 = vector.multi_reduction <add>, %95, %cst_29 [1] : vector<8x32xf32> to vector<8xf32>
    %97 = vector.shape_cast %96 : vector<8xf32> to vector<8x1xf32>
    %cst_30 = arith.constant 3.200000e+01 : f32
    %98 = vector.broadcast %cst_30 : f32 to vector<8x1xf32>
    %99 = arith.divf %97, %98 : vector<8x1xf32>
    %100 = vector.broadcast %99 : vector<8x1xf32> to vector<8x32xf32>
    %101 = arith.subf %95, %100 : vector<8x32xf32>
    %102 = arith.mulf %101, %101 : vector<8x32xf32>
    %cst_31 = arith.constant dense<0.000000e+00> : vector<8xf32>
    %103 = vector.multi_reduction <add>, %102, %cst_31 [1] : vector<8x32xf32> to vector<8xf32>
    %104 = vector.shape_cast %103 : vector<8xf32> to vector<8x1xf32>
    %cst_32 = arith.constant 3.200000e+01 : f32
    %105 = vector.broadcast %cst_32 : f32 to vector<8x1xf32>
    %106 = arith.divf %104, %105 : vector<8x1xf32>
    %107 = vector.broadcast %99 : vector<8x1xf32> to vector<8x32xf32>
    %108 = arith.subf %95, %107 : vector<8x32xf32>
    %cst_33 = arith.constant 9.99999974E-6 : f32
    %109 = vector.broadcast %cst_33 : f32 to vector<8x1xf32>
    %110 = arith.addf %106, %109 : vector<8x1xf32>
    %111 = math.rsqrt %110 : vector<8x1xf32>
    %112 = vector.broadcast %111 : vector<8x1xf32> to vector<8x32xf32>
    %113 = arith.mulf %108, %112 : vector<8x32xf32>
    %c3 = arith.constant 3 : index
    %c0_34 = arith.constant 0 : index
    %114 = vector.load %arg16[%c3, %c0_34] : memref<18x32xf32, #tpu.memory_space<vmem>>, vector<1x32xf32>
    %115 = vector.broadcast %114 : vector<1x32xf32> to vector<8x32xf32>
    %116 = arith.mulf %113, %115 : vector<8x32xf32>
    %c4 = arith.constant 4 : index
    %c0_35 = arith.constant 0 : index
    %117 = vector.load %arg16[%c4, %c0_35] : memref<18x32xf32, #tpu.memory_space<vmem>>, vector<1x32xf32>
    %118 = vector.broadcast %117 : vector<1x32xf32> to vector<8x32xf32>
    %119 = arith.addf %116, %118 : vector<8x32xf32>
    %120 = arith.truncf %119 : vector<8x32xf32> to vector<8x32xbf16>
    %c0_36 = arith.constant 0 : index
    %c0_37 = arith.constant 0 : index
    %121 = vector.load %arg8[%c0_36, %c0_37] : memref<32x96xbf16, #tpu.memory_space<vmem>>, vector<32x96xbf16>
    %cst_38 = arith.constant dense<0.000000e+00> : vector<8x96xf32>
    %122 = tpu.matmul %120, %121, %cst_38 {dimension_numbers = #tpu.dot_dimension_numbers<[1], [0], [0], [1], [0, 0, 1, 1], [], []>} : vector<8x32xbf16>, vector<32x96xbf16>, vector<8x96xf32> -> vector<8x96xf32>
    %123 = arith.truncf %122 : vector<8x96xf32> to vector<8x96xbf16>
    %c0_39 = arith.constant 0 : index
    %c0_40 = arith.constant 0 : index
    %124 = vector.load %arg10[%c0_39, %c0_40] : memref<8x8xf32, #tpu.memory_space<vmem>>, vector<8x8xf32>
    %c0_41 = arith.constant 0 : index
    %c0_42 = arith.constant 0 : index
    %125 = vector.load %arg11[%c0_41, %c0_42] : memref<8x8xf32, #tpu.memory_space<vmem>>, vector<8x8xf32>
    %c0_43 = arith.constant 0 : index
    %c0_44 = arith.constant 0 : index
    %126 = vector.load %arg9[%c0_43, %c0_44] : memref<32x32xbf16, #tpu.memory_space<vmem>>, vector<32x32xbf16>
    %cst_45 = arith.constant 0.000000e+00 : f32
    %127 = vector.broadcast %cst_45 : f32 to vector<8x32xf32>
    %128 = vector.extract_strided_slice %123 {offsets = [0, 0], sizes = [8, 8], strides = [1, 1]} : vector<8x96xbf16> to vector<8x8xbf16>
    %129 = arith.extf %128 : vector<8x8xbf16> to vector<8x8xf32>
    %130 = arith.mulf %129, %124 : vector<8x8xf32>
    %c4_i32 = arith.constant 4 : i32
    %131 = tpu.dynamic_rotate %129 by %c4_i32 dim 1 : vector<8x8xf32>, i32 -> vector<8x8xf32>
    %132 = arith.mulf %131, %125 : vector<8x8xf32>
    %133 = arith.addf %130, %132 : vector<8x8xf32>
    %134 = arith.truncf %133 : vector<8x8xf32> to vector<8x8xbf16>
    %135 = vector.extract_strided_slice %123 {offsets = [0, 32], sizes = [8, 8], strides = [1, 1]} : vector<8x96xbf16> to vector<8x8xbf16>
    %136 = arith.extf %135 : vector<8x8xbf16> to vector<8x8xf32>
    %137 = arith.mulf %136, %124 : vector<8x8xf32>
    %c4_i32_46 = arith.constant 4 : i32
    %138 = tpu.dynamic_rotate %136 by %c4_i32_46 dim 1 : vector<8x8xf32>, i32 -> vector<8x8xf32>
    %139 = arith.mulf %138, %125 : vector<8x8xf32>
    %140 = arith.addf %137, %139 : vector<8x8xf32>
    %141 = arith.truncf %140 : vector<8x8xf32> to vector<8x8xbf16>
    %142 = vector.extract_strided_slice %123 {offsets = [0, 64], sizes = [8, 8], strides = [1, 1]} : vector<8x96xbf16> to vector<8x8xbf16>
    %cst_47 = arith.constant dense<0.000000e+00> : vector<8x8xf32>
    %143 = tpu.matmul %134, %141, %cst_47 {dimension_numbers = #tpu.dot_dimension_numbers<[1], [1], [0], [0], [0, 0, 1, 0], [], []>} : vector<8x8xbf16>, vector<8x8xbf16>, vector<8x8xf32> -> vector<8x8xf32>
    %cst_48 = arith.constant 0.353553385 : f32
    %144 = vector.broadcast %cst_48 : f32 to vector<8x8xf32>
    %145 = arith.mulf %143, %144 : vector<8x8xf32>
    %cst_49 = arith.constant dense<0xFF800000> : vector<8xf32>
    %146 = vector.multi_reduction <maximumf>, %145, %cst_49 [1] : vector<8x8xf32> to vector<8xf32>
    %147 = vector.shape_cast %146 : vector<8xf32> to vector<8x1xf32>
    %148 = vector.broadcast %147 : vector<8x1xf32> to vector<8x8xf32>
    %149 = arith.subf %145, %148 : vector<8x8xf32>
    %150 = math.exp %149 : vector<8x8xf32>
    %cst_50 = arith.constant dense<0.000000e+00> : vector<8xf32>
    %151 = vector.multi_reduction <add>, %150, %cst_50 [1] : vector<8x8xf32> to vector<8xf32>
    %152 = vector.shape_cast %151 : vector<8xf32> to vector<8x1xf32>
    %153 = arith.truncf %150 : vector<8x8xf32> to vector<8x8xbf16>
    %cst_51 = arith.constant dense<0.000000e+00> : vector<8x8xf32>
    %154 = tpu.matmul %153, %142, %cst_51 {dimension_numbers = #tpu.dot_dimension_numbers<[1], [0], [0], [1], [0, 0, 1, 1], [], []>} : vector<8x8xbf16>, vector<8x8xbf16>, vector<8x8xf32> -> vector<8x8xf32>
    %155 = vector.broadcast %152 : vector<8x1xf32> to vector<8x8xf32>
    %156 = arith.divf %154, %155 : vector<8x8xf32>
    %157 = arith.truncf %156 : vector<8x8xf32> to vector<8x8xbf16>
    %158 = vector.extract_strided_slice %126 {offsets = [0, 0], sizes = [8, 32], strides = [1, 1]} : vector<32x32xbf16> to vector<8x32xbf16>
    %cst_52 = arith.constant dense<0.000000e+00> : vector<8x32xf32>
    %159 = tpu.matmul %157, %158, %cst_52 {dimension_numbers = #tpu.dot_dimension_numbers<[1], [0], [0], [1], [0, 0, 1, 1], [], []>} : vector<8x8xbf16>, vector<8x32xbf16>, vector<8x32xf32> -> vector<8x32xf32>
    %160 = arith.addf %127, %159 : vector<8x32xf32>
    %161 = vector.extract_strided_slice %123 {offsets = [0, 8], sizes = [8, 8], strides = [1, 1]} : vector<8x96xbf16> to vector<8x8xbf16>
    %162 = arith.extf %161 : vector<8x8xbf16> to vector<8x8xf32>
    %163 = arith.mulf %162, %124 : vector<8x8xf32>
    %c4_i32_53 = arith.constant 4 : i32
    %164 = tpu.dynamic_rotate %162 by %c4_i32_53 dim 1 : vector<8x8xf32>, i32 -> vector<8x8xf32>
    %165 = arith.mulf %164, %125 : vector<8x8xf32>
    %166 = arith.addf %163, %165 : vector<8x8xf32>
    %167 = arith.truncf %166 : vector<8x8xf32> to vector<8x8xbf16>
    %168 = vector.extract_strided_slice %123 {offsets = [0, 40], sizes = [8, 8], strides = [1, 1]} : vector<8x96xbf16> to vector<8x8xbf16>
    %169 = arith.extf %168 : vector<8x8xbf16> to vector<8x8xf32>
    %170 = arith.mulf %169, %124 : vector<8x8xf32>
    %c4_i32_54 = arith.constant 4 : i32
    %171 = tpu.dynamic_rotate %169 by %c4_i32_54 dim 1 : vector<8x8xf32>, i32 -> vector<8x8xf32>
    %172 = arith.mulf %171, %125 : vector<8x8xf32>
    %173 = arith.addf %170, %172 : vector<8x8xf32>
    %174 = arith.truncf %173 : vector<8x8xf32> to vector<8x8xbf16>
    %175 = vector.extract_strided_slice %123 {offsets = [0, 72], sizes = [8, 8], strides = [1, 1]} : vector<8x96xbf16> to vector<8x8xbf16>
    %cst_55 = arith.constant dense<0.000000e+00> : vector<8x8xf32>
    %176 = tpu.matmul %167, %174, %cst_55 {dimension_numbers = #tpu.dot_dimension_numbers<[1], [1], [0], [0], [0, 0, 1, 0], [], []>} : vector<8x8xbf16>, vector<8x8xbf16>, vector<8x8xf32> -> vector<8x8xf32>
    %cst_56 = arith.constant 0.353553385 : f32
    %177 = vector.broadcast %cst_56 : f32 to vector<8x8xf32>
    %178 = arith.mulf %176, %177 : vector<8x8xf32>
    %cst_57 = arith.constant dense<0xFF800000> : vector<8xf32>
    %179 = vector.multi_reduction <maximumf>, %178, %cst_57 [1] : vector<8x8xf32> to vector<8xf32>
    %180 = vector.shape_cast %179 : vector<8xf32> to vector<8x1xf32>
    %181 = vector.broadcast %180 : vector<8x1xf32> to vector<8x8xf32>
    %182 = arith.subf %178, %181 : vector<8x8xf32>
    %183 = math.exp %182 : vector<8x8xf32>
    %cst_58 = arith.constant dense<0.000000e+00> : vector<8xf32>
    %184 = vector.multi_reduction <add>, %183, %cst_58 [1] : vector<8x8xf32> to vector<8xf32>
    %185 = vector.shape_cast %184 : vector<8xf32> to vector<8x1xf32>
    %186 = arith.truncf %183 : vector<8x8xf32> to vector<8x8xbf16>
    %cst_59 = arith.constant dense<0.000000e+00> : vector<8x8xf32>
    %187 = tpu.matmul %186, %175, %cst_59 {dimension_numbers = #tpu.dot_dimension_numbers<[1], [0], [0], [1], [0, 0, 1, 1], [], []>} : vector<8x8xbf16>, vector<8x8xbf16>, vector<8x8xf32> -> vector<8x8xf32>
    %188 = vector.broadcast %185 : vector<8x1xf32> to vector<8x8xf32>
    %189 = arith.divf %187, %188 : vector<8x8xf32>
    %190 = arith.truncf %189 : vector<8x8xf32> to vector<8x8xbf16>
    %191 = vector.extract_strided_slice %126 {offsets = [8, 0], sizes = [8, 32], strides = [1, 1]} : vector<32x32xbf16> to vector<8x32xbf16>
    %cst_60 = arith.constant dense<0.000000e+00> : vector<8x32xf32>
    %192 = tpu.matmul %190, %191, %cst_60 {dimension_numbers = #tpu.dot_dimension_numbers<[1], [0], [0], [1], [0, 0, 1, 1], [], []>} : vector<8x8xbf16>, vector<8x32xbf16>, vector<8x32xf32> -> vector<8x32xf32>
    %193 = arith.addf %160, %192 : vector<8x32xf32>
    %194 = vector.extract_strided_slice %123 {offsets = [0, 16], sizes = [8, 8], strides = [1, 1]} : vector<8x96xbf16> to vector<8x8xbf16>
    %195 = arith.extf %194 : vector<8x8xbf16> to vector<8x8xf32>
    %196 = arith.mulf %195, %124 : vector<8x8xf32>
    %c4_i32_61 = arith.constant 4 : i32
    %197 = tpu.dynamic_rotate %195 by %c4_i32_61 dim 1 : vector<8x8xf32>, i32 -> vector<8x8xf32>
    %198 = arith.mulf %197, %125 : vector<8x8xf32>
    %199 = arith.addf %196, %198 : vector<8x8xf32>
    %200 = arith.truncf %199 : vector<8x8xf32> to vector<8x8xbf16>
    %201 = vector.extract_strided_slice %123 {offsets = [0, 48], sizes = [8, 8], strides = [1, 1]} : vector<8x96xbf16> to vector<8x8xbf16>
    %202 = arith.extf %201 : vector<8x8xbf16> to vector<8x8xf32>
    %203 = arith.mulf %202, %124 : vector<8x8xf32>
    %c4_i32_62 = arith.constant 4 : i32
    %204 = tpu.dynamic_rotate %202 by %c4_i32_62 dim 1 : vector<8x8xf32>, i32 -> vector<8x8xf32>
    %205 = arith.mulf %204, %125 : vector<8x8xf32>
    %206 = arith.addf %203, %205 : vector<8x8xf32>
    %207 = arith.truncf %206 : vector<8x8xf32> to vector<8x8xbf16>
    %208 = vector.extract_strided_slice %123 {offsets = [0, 80], sizes = [8, 8], strides = [1, 1]} : vector<8x96xbf16> to vector<8x8xbf16>
    %cst_63 = arith.constant dense<0.000000e+00> : vector<8x8xf32>
    %209 = tpu.matmul %200, %207, %cst_63 {dimension_numbers = #tpu.dot_dimension_numbers<[1], [1], [0], [0], [0, 0, 1, 0], [], []>} : vector<8x8xbf16>, vector<8x8xbf16>, vector<8x8xf32> -> vector<8x8xf32>
    %cst_64 = arith.constant 0.353553385 : f32
    %210 = vector.broadcast %cst_64 : f32 to vector<8x8xf32>
    %211 = arith.mulf %209, %210 : vector<8x8xf32>
    %cst_65 = arith.constant dense<0xFF800000> : vector<8xf32>
    %212 = vector.multi_reduction <maximumf>, %211, %cst_65 [1] : vector<8x8xf32> to vector<8xf32>
    %213 = vector.shape_cast %212 : vector<8xf32> to vector<8x1xf32>
    %214 = vector.broadcast %213 : vector<8x1xf32> to vector<8x8xf32>
    %215 = arith.subf %211, %214 : vector<8x8xf32>
    %216 = math.exp %215 : vector<8x8xf32>
    %cst_66 = arith.constant dense<0.000000e+00> : vector<8xf32>
    %217 = vector.multi_reduction <add>, %216, %cst_66 [1] : vector<8x8xf32> to vector<8xf32>
    %218 = vector.shape_cast %217 : vector<8xf32> to vector<8x1xf32>
    %219 = arith.truncf %216 : vector<8x8xf32> to vector<8x8xbf16>
    %cst_67 = arith.constant dense<0.000000e+00> : vector<8x8xf32>
    %220 = tpu.matmul %219, %208, %cst_67 {dimension_numbers = #tpu.dot_dimension_numbers<[1], [0], [0], [1], [0, 0, 1, 1], [], []>} : vector<8x8xbf16>, vector<8x8xbf16>, vector<8x8xf32> -> vector<8x8xf32>
    %221 = vector.broadcast %218 : vector<8x1xf32> to vector<8x8xf32>
    %222 = arith.divf %220, %221 : vector<8x8xf32>
    %223 = arith.truncf %222 : vector<8x8xf32> to vector<8x8xbf16>
    %224 = vector.extract_strided_slice %126 {offsets = [16, 0], sizes = [8, 32], strides = [1, 1]} : vector<32x32xbf16> to vector<8x32xbf16>
    %cst_68 = arith.constant dense<0.000000e+00> : vector<8x32xf32>
    %225 = tpu.matmul %223, %224, %cst_68 {dimension_numbers = #tpu.dot_dimension_numbers<[1], [0], [0], [1], [0, 0, 1, 1], [], []>} : vector<8x8xbf16>, vector<8x32xbf16>, vector<8x32xf32> -> vector<8x32xf32>
    %226 = arith.addf %193, %225 : vector<8x32xf32>
    %227 = vector.extract_strided_slice %123 {offsets = [0, 24], sizes = [8, 8], strides = [1, 1]} : vector<8x96xbf16> to vector<8x8xbf16>
    %228 = arith.extf %227 : vector<8x8xbf16> to vector<8x8xf32>
    %229 = arith.mulf %228, %124 : vector<8x8xf32>
    %c4_i32_69 = arith.constant 4 : i32
    %230 = tpu.dynamic_rotate %228 by %c4_i32_69 dim 1 : vector<8x8xf32>, i32 -> vector<8x8xf32>
    %231 = arith.mulf %230, %125 : vector<8x8xf32>
    %232 = arith.addf %229, %231 : vector<8x8xf32>
    %233 = arith.truncf %232 : vector<8x8xf32> to vector<8x8xbf16>
    %234 = vector.extract_strided_slice %123 {offsets = [0, 56], sizes = [8, 8], strides = [1, 1]} : vector<8x96xbf16> to vector<8x8xbf16>
    %235 = arith.extf %234 : vector<8x8xbf16> to vector<8x8xf32>
    %236 = arith.mulf %235, %124 : vector<8x8xf32>
    %c4_i32_70 = arith.constant 4 : i32
    %237 = tpu.dynamic_rotate %235 by %c4_i32_70 dim 1 : vector<8x8xf32>, i32 -> vector<8x8xf32>
    %238 = arith.mulf %237, %125 : vector<8x8xf32>
    %239 = arith.addf %236, %238 : vector<8x8xf32>
    %240 = arith.truncf %239 : vector<8x8xf32> to vector<8x8xbf16>
    %241 = vector.extract_strided_slice %123 {offsets = [0, 88], sizes = [8, 8], strides = [1, 1]} : vector<8x96xbf16> to vector<8x8xbf16>
    %cst_71 = arith.constant dense<0.000000e+00> : vector<8x8xf32>
    %242 = tpu.matmul %233, %240, %cst_71 {dimension_numbers = #tpu.dot_dimension_numbers<[1], [1], [0], [0], [0, 0, 1, 0], [], []>} : vector<8x8xbf16>, vector<8x8xbf16>, vector<8x8xf32> -> vector<8x8xf32>
    %cst_72 = arith.constant 0.353553385 : f32
    %243 = vector.broadcast %cst_72 : f32 to vector<8x8xf32>
    %244 = arith.mulf %242, %243 : vector<8x8xf32>
    %cst_73 = arith.constant dense<0xFF800000> : vector<8xf32>
    %245 = vector.multi_reduction <maximumf>, %244, %cst_73 [1] : vector<8x8xf32> to vector<8xf32>
    %246 = vector.shape_cast %245 : vector<8xf32> to vector<8x1xf32>
    %247 = vector.broadcast %246 : vector<8x1xf32> to vector<8x8xf32>
    %248 = arith.subf %244, %247 : vector<8x8xf32>
    %249 = math.exp %248 : vector<8x8xf32>
    %cst_74 = arith.constant dense<0.000000e+00> : vector<8xf32>
    %250 = vector.multi_reduction <add>, %249, %cst_74 [1] : vector<8x8xf32> to vector<8xf32>
    %251 = vector.shape_cast %250 : vector<8xf32> to vector<8x1xf32>
    %252 = arith.truncf %249 : vector<8x8xf32> to vector<8x8xbf16>
    %cst_75 = arith.constant dense<0.000000e+00> : vector<8x8xf32>
    %253 = tpu.matmul %252, %241, %cst_75 {dimension_numbers = #tpu.dot_dimension_numbers<[1], [0], [0], [1], [0, 0, 1, 1], [], []>} : vector<8x8xbf16>, vector<8x8xbf16>, vector<8x8xf32> -> vector<8x8xf32>
    %254 = vector.broadcast %251 : vector<8x1xf32> to vector<8x8xf32>
    %255 = arith.divf %253, %254 : vector<8x8xf32>
    %256 = arith.truncf %255 : vector<8x8xf32> to vector<8x8xbf16>
    %257 = vector.extract_strided_slice %126 {offsets = [24, 0], sizes = [8, 32], strides = [1, 1]} : vector<32x32xbf16> to vector<8x32xbf16>
    %cst_76 = arith.constant dense<0.000000e+00> : vector<8x32xf32>
    %258 = tpu.matmul %256, %257, %cst_76 {dimension_numbers = #tpu.dot_dimension_numbers<[1], [0], [0], [1], [0, 0, 1, 1], [], []>} : vector<8x8xbf16>, vector<8x32xbf16>, vector<8x32xf32> -> vector<8x32xf32>
    %259 = arith.addf %226, %258 : vector<8x32xf32>
    %260 = arith.addf %95, %259 : vector<8x32xf32>
    %261 = arith.addf %95, %260 : vector<8x32xf32>
    %cst_77 = arith.constant dense<0.000000e+00> : vector<8xf32>
    %262 = vector.multi_reduction <add>, %261, %cst_77 [1] : vector<8x32xf32> to vector<8xf32>
    %263 = vector.shape_cast %262 : vector<8xf32> to vector<8x1xf32>
    %cst_78 = arith.constant 3.200000e+01 : f32
    %264 = vector.broadcast %cst_78 : f32 to vector<8x1xf32>
    %265 = arith.divf %263, %264 : vector<8x1xf32>
    %266 = vector.broadcast %265 : vector<8x1xf32> to vector<8x32xf32>
    %267 = arith.subf %261, %266 : vector<8x32xf32>
    %268 = arith.mulf %267, %267 : vector<8x32xf32>
    %cst_79 = arith.constant dense<0.000000e+00> : vector<8xf32>
    %269 = vector.multi_reduction <add>, %268, %cst_79 [1] : vector<8x32xf32> to vector<8xf32>
    %270 = vector.shape_cast %269 : vector<8xf32> to vector<8x1xf32>
    %cst_80 = arith.constant 3.200000e+01 : f32
    %271 = vector.broadcast %cst_80 : f32 to vector<8x1xf32>
    %272 = arith.divf %270, %271 : vector<8x1xf32>
    %273 = vector.broadcast %265 : vector<8x1xf32> to vector<8x32xf32>
    %274 = arith.subf %261, %273 : vector<8x32xf32>
    %cst_81 = arith.constant 9.99999974E-6 : f32
    %275 = vector.broadcast %cst_81 : f32 to vector<8x1xf32>
    %276 = arith.addf %272, %275 : vector<8x1xf32>
    %277 = math.rsqrt %276 : vector<8x1xf32>
    %278 = vector.broadcast %277 : vector<8x1xf32> to vector<8x32xf32>
    %279 = arith.mulf %274, %278 : vector<8x32xf32>
    %c5 = arith.constant 5 : index
    %c0_82 = arith.constant 0 : index
    %280 = vector.load %arg16[%c5, %c0_82] : memref<18x32xf32, #tpu.memory_space<vmem>>, vector<1x32xf32>
    %281 = vector.broadcast %280 : vector<1x32xf32> to vector<8x32xf32>
    %282 = arith.mulf %279, %281 : vector<8x32xf32>
    %c6 = arith.constant 6 : index
    %c0_83 = arith.constant 0 : index
    %283 = vector.load %arg16[%c6, %c0_83] : memref<18x32xf32, #tpu.memory_space<vmem>>, vector<1x32xf32>
    %284 = vector.broadcast %283 : vector<1x32xf32> to vector<8x32xf32>
    %285 = arith.addf %282, %284 : vector<8x32xf32>
    %286 = arith.truncf %285 : vector<8x32xf32> to vector<8x32xbf16>
    %c0_84 = arith.constant 0 : index
    %c0_85 = arith.constant 0 : index
    %287 = vector.load %arg12[%c0_84, %c0_85] : memref<32x64xbf16, #tpu.memory_space<vmem>>, vector<32x64xbf16>
    %cst_86 = arith.constant dense<0.000000e+00> : vector<8x64xf32>
    %288 = tpu.matmul %286, %287, %cst_86 {dimension_numbers = #tpu.dot_dimension_numbers<[1], [0], [0], [1], [0, 0, 1, 1], [], []>} : vector<8x32xbf16>, vector<32x64xbf16>, vector<8x64xf32> -> vector<8x64xf32>
    %c0_87 = arith.constant 0 : index
    %c0_88 = arith.constant 0 : index
    %289 = vector.load %arg13[%c0_87, %c0_88] : memref<1x64xf32, #tpu.memory_space<vmem>>, vector<1x64xf32>
    %290 = vector.broadcast %289 : vector<1x64xf32> to vector<8x64xf32>
    %291 = arith.addf %288, %290 : vector<8x64xf32>
    %292 = vector.extract_strided_slice %291 {offsets = [0, 0], sizes = [8, 32], strides = [1, 1]} : vector<8x64xf32> to vector<8x32xf32>
    %293 = vector.extract_strided_slice %291 {offsets = [0, 32], sizes = [8, 32], strides = [1, 1]} : vector<8x64xf32> to vector<8x32xf32>
    %294 = arith.negf %293 : vector<8x32xf32>
    %295 = math.exp %294 : vector<8x32xf32>
    %cst_89 = arith.constant 1.000000e+00 : f32
    %296 = vector.broadcast %cst_89 : f32 to vector<8x32xf32>
    %297 = arith.addf %296, %295 : vector<8x32xf32>
    %298 = arith.divf %296, %297 : vector<8x32xf32>
    %299 = arith.mulf %292, %298 : vector<8x32xf32>
    %300 = tpu.iota {dimensions = array<i32: 0>} : vector<8x1xi32>
    %c0_i32 = arith.constant 0 : i32
    %301 = vector.broadcast %c0_i32 : i32 to vector<8x1xi32>
    %302 = arith.cmpi sgt, %300, %301 : vector<8x1xi32>
    %303 = arith.extui %302 : vector<8x1xi1> to vector<8x1xi32>
    %304 = arith.sitofp %303 : vector<8x1xi32> to vector<8x1xf32>
    %c7_i32 = arith.constant 7 : i32
    %305 = vector.broadcast %c7_i32 : i32 to vector<8x1xi32>
    %306 = arith.cmpi slt, %300, %305 : vector<8x1xi32>
    %307 = arith.extui %306 : vector<8x1xi1> to vector<8x1xi32>
    %308 = arith.sitofp %307 : vector<8x1xi32> to vector<8x1xf32>
    %c1_i32 = arith.constant 1 : i32
    %309 = tpu.dynamic_rotate %299 by %c1_i32 dim 0 : vector<8x32xf32>, i32 -> vector<8x32xf32>
    %310 = vector.broadcast %304 : vector<8x1xf32> to vector<8x32xf32>
    %311 = arith.mulf %309, %310 : vector<8x32xf32>
    %c7_i32_90 = arith.constant 7 : i32
    %312 = tpu.dynamic_rotate %299 by %c7_i32_90 dim 0 : vector<8x32xf32>, i32 -> vector<8x32xf32>
    %313 = vector.broadcast %308 : vector<8x1xf32> to vector<8x32xf32>
    %314 = arith.mulf %312, %313 : vector<8x32xf32>
    %c7 = arith.constant 7 : index
    %c0_91 = arith.constant 0 : index
    %315 = vector.load %arg16[%c7, %c0_91] : memref<18x32xf32, #tpu.memory_space<vmem>>, vector<1x32xf32>
    %316 = vector.broadcast %315 : vector<1x32xf32> to vector<8x32xf32>
    %317 = arith.mulf %311, %316 : vector<8x32xf32>
    %c8 = arith.constant 8 : index
    %c0_92 = arith.constant 0 : index
    %318 = vector.load %arg16[%c8, %c0_92] : memref<18x32xf32, #tpu.memory_space<vmem>>, vector<1x32xf32>
    %319 = vector.broadcast %318 : vector<1x32xf32> to vector<8x32xf32>
    %320 = arith.mulf %299, %319 : vector<8x32xf32>
    %321 = arith.addf %317, %320 : vector<8x32xf32>
    %c9 = arith.constant 9 : index
    %c0_93 = arith.constant 0 : index
    %322 = vector.load %arg16[%c9, %c0_93] : memref<18x32xf32, #tpu.memory_space<vmem>>, vector<1x32xf32>
    %323 = vector.broadcast %322 : vector<1x32xf32> to vector<8x32xf32>
    %324 = arith.mulf %314, %323 : vector<8x32xf32>
    %325 = arith.addf %321, %324 : vector<8x32xf32>
    %326 = arith.negf %325 : vector<8x32xf32>
    %327 = math.exp %326 : vector<8x32xf32>
    %cst_94 = arith.constant 1.000000e+00 : f32
    %328 = vector.broadcast %cst_94 : f32 to vector<8x32xf32>
    %329 = arith.addf %328, %327 : vector<8x32xf32>
    %330 = arith.divf %328, %329 : vector<8x32xf32>
    %331 = arith.mulf %325, %330 : vector<8x32xf32>
    %c0_95 = arith.constant 0 : index
    %c0_96 = arith.constant 0 : index
    %332 = vector.load %arg14[%c0_95, %c0_96] : memref<32x32xf32, #tpu.memory_space<vmem>>, vector<32x32xf32>
    %cst_97 = arith.constant dense<0.000000e+00> : vector<32xf32>
    %333 = vector.multi_reduction <add>, %331, %cst_97 [0] : vector<8x32xf32> to vector<32xf32>
    %334 = vector.shape_cast %333 : vector<32xf32> to vector<1x32xf32>
    %cst_98 = arith.constant dense<0.000000e+00> : vector<1x32xf32>
    %335 = tpu.matmul %334, %332, %cst_98 {dimension_numbers = #tpu.dot_dimension_numbers<[1], [0], [0], [1], [0, 0, 1, 1], [], []>} : vector<1x32xf32>, vector<32x32xf32>, vector<1x32xf32> -> vector<1x32xf32>
    %cst_99 = arith.constant 1.250000e-01 : f32
    %336 = vector.broadcast %cst_99 : f32 to vector<1x32xf32>
    %337 = arith.mulf %335, %336 : vector<1x32xf32>
    %338 = vector.broadcast %337 : vector<1x32xf32> to vector<8x32xf32>
    %339 = arith.subf %331, %338 : vector<8x32xf32>
    %340 = arith.mulf %339, %339 : vector<8x32xf32>
    %cst_100 = arith.constant dense<0.000000e+00> : vector<32xf32>
    %341 = vector.multi_reduction <add>, %340, %cst_100 [0] : vector<8x32xf32> to vector<32xf32>
    %342 = vector.shape_cast %341 : vector<32xf32> to vector<1x32xf32>
    %cst_101 = arith.constant dense<0.000000e+00> : vector<1x32xf32>
    %343 = tpu.matmul %342, %332, %cst_101 {dimension_numbers = #tpu.dot_dimension_numbers<[1], [0], [0], [1], [0, 0, 1, 1], [], []>} : vector<1x32xf32>, vector<32x32xf32>, vector<1x32xf32> -> vector<1x32xf32>
    %cst_102 = arith.constant 1.250000e-01 : f32
    %344 = vector.broadcast %cst_102 : f32 to vector<1x32xf32>
    %345 = arith.mulf %343, %344 : vector<1x32xf32>
    %cst_103 = arith.constant 9.99999974E-6 : f32
    %346 = vector.broadcast %cst_103 : f32 to vector<1x32xf32>
    %347 = arith.addf %345, %346 : vector<1x32xf32>
    %348 = math.rsqrt %347 : vector<1x32xf32>
    %349 = vector.broadcast %348 : vector<1x32xf32> to vector<8x32xf32>
    %350 = arith.mulf %339, %349 : vector<8x32xf32>
    %c10 = arith.constant 10 : index
    %c0_104 = arith.constant 0 : index
    %351 = vector.load %arg16[%c10, %c0_104] : memref<18x32xf32, #tpu.memory_space<vmem>>, vector<1x32xf32>
    %352 = vector.broadcast %351 : vector<1x32xf32> to vector<8x32xf32>
    %353 = arith.mulf %350, %352 : vector<8x32xf32>
    %c11 = arith.constant 11 : index
    %c0_105 = arith.constant 0 : index
    %354 = vector.load %arg16[%c11, %c0_105] : memref<18x32xf32, #tpu.memory_space<vmem>>, vector<1x32xf32>
    %355 = vector.broadcast %354 : vector<1x32xf32> to vector<8x32xf32>
    %356 = arith.addf %353, %355 : vector<8x32xf32>
    %357 = arith.truncf %356 : vector<8x32xf32> to vector<8x32xbf16>
    %c0_106 = arith.constant 0 : index
    %c0_107 = arith.constant 0 : index
    %358 = vector.load %arg15[%c0_106, %c0_107] : memref<32x32xbf16, #tpu.memory_space<vmem>>, vector<32x32xbf16>
    %cst_108 = arith.constant dense<0.000000e+00> : vector<8x32xf32>
    %359 = tpu.matmul %357, %358, %cst_108 {dimension_numbers = #tpu.dot_dimension_numbers<[1], [0], [0], [1], [0, 0, 1, 1], [], []>} : vector<8x32xbf16>, vector<32x32xbf16>, vector<8x32xf32> -> vector<8x32xf32>
    %c12 = arith.constant 12 : index
    %c0_109 = arith.constant 0 : index
    %360 = vector.load %arg16[%c12, %c0_109] : memref<18x32xf32, #tpu.memory_space<vmem>>, vector<1x32xf32>
    %361 = vector.broadcast %360 : vector<1x32xf32> to vector<8x32xf32>
    %362 = arith.addf %359, %361 : vector<8x32xf32>
    %363 = arith.addf %261, %362 : vector<8x32xf32>
    %364 = arith.addf %261, %363 : vector<8x32xf32>
    %cst_110 = arith.constant dense<0.000000e+00> : vector<8xf32>
    %365 = vector.multi_reduction <add>, %364, %cst_110 [1] : vector<8x32xf32> to vector<8xf32>
    %366 = vector.shape_cast %365 : vector<8xf32> to vector<8x1xf32>
    %cst_111 = arith.constant 3.200000e+01 : f32
    %367 = vector.broadcast %cst_111 : f32 to vector<8x1xf32>
    %368 = arith.divf %366, %367 : vector<8x1xf32>
    %369 = vector.broadcast %368 : vector<8x1xf32> to vector<8x32xf32>
    %370 = arith.subf %364, %369 : vector<8x32xf32>
    %371 = arith.mulf %370, %370 : vector<8x32xf32>
    %cst_112 = arith.constant dense<0.000000e+00> : vector<8xf32>
    %372 = vector.multi_reduction <add>, %371, %cst_112 [1] : vector<8x32xf32> to vector<8xf32>
    %373 = vector.shape_cast %372 : vector<8xf32> to vector<8x1xf32>
    %cst_113 = arith.constant 3.200000e+01 : f32
    %374 = vector.broadcast %cst_113 : f32 to vector<8x1xf32>
    %375 = arith.divf %373, %374 : vector<8x1xf32>
    %376 = vector.broadcast %368 : vector<8x1xf32> to vector<8x32xf32>
    %377 = arith.subf %364, %376 : vector<8x32xf32>
    %cst_114 = arith.constant 9.99999974E-6 : f32
    %378 = vector.broadcast %cst_114 : f32 to vector<8x1xf32>
    %379 = arith.addf %375, %378 : vector<8x1xf32>
    %380 = math.rsqrt %379 : vector<8x1xf32>
    %381 = vector.broadcast %380 : vector<8x1xf32> to vector<8x32xf32>
    %382 = arith.mulf %377, %381 : vector<8x32xf32>
    %c13 = arith.constant 13 : index
    %c0_115 = arith.constant 0 : index
    %383 = vector.load %arg16[%c13, %c0_115] : memref<18x32xf32, #tpu.memory_space<vmem>>, vector<1x32xf32>
    %384 = vector.broadcast %383 : vector<1x32xf32> to vector<8x32xf32>
    %385 = arith.mulf %382, %384 : vector<8x32xf32>
    %c14 = arith.constant 14 : index
    %c0_116 = arith.constant 0 : index
    %386 = vector.load %arg16[%c14, %c0_116] : memref<18x32xf32, #tpu.memory_space<vmem>>, vector<1x32xf32>
    %387 = vector.broadcast %386 : vector<1x32xf32> to vector<8x32xf32>
    %388 = arith.addf %385, %387 : vector<8x32xf32>
    %389 = arith.truncf %388 : vector<8x32xf32> to vector<8x32xbf16>
    %c0_117 = arith.constant 0 : index
    %c0_118 = arith.constant 0 : index
    %390 = vector.load %arg5[%c0_117, %c0_118] : memref<32x128xbf16, #tpu.memory_space<vmem>>, vector<32x128xbf16>
    %c0_119 = arith.constant 0 : index
    %c0_120 = arith.constant 0 : index
    %391 = vector.load %arg6[%c0_119, %c0_120] : memref<1x128xf32, #tpu.memory_space<vmem>>, vector<1x128xf32>
    %c0_121 = arith.constant 0 : index
    %c0_122 = arith.constant 0 : index
    %392 = vector.load %arg7[%c0_121, %c0_122] : memref<128x32xbf16, #tpu.memory_space<vmem>>, vector<128x32xbf16>
    %cst_123 = arith.constant 0.000000e+00 : f32
    %393 = vector.broadcast %cst_123 : f32 to vector<8x32xf32>
    %394 = vector.extract_strided_slice %390 {offsets = [0, 0], sizes = [32, 32], strides = [1, 1]} : vector<32x128xbf16> to vector<32x32xbf16>
    %cst_124 = arith.constant dense<0.000000e+00> : vector<8x32xf32>
    %395 = tpu.matmul %389, %394, %cst_124 {dimension_numbers = #tpu.dot_dimension_numbers<[1], [0], [0], [1], [0, 0, 1, 1], [], []>} : vector<8x32xbf16>, vector<32x32xbf16>, vector<8x32xf32> -> vector<8x32xf32>
    %396 = vector.extract_strided_slice %391 {offsets = [0, 0], sizes = [1, 32], strides = [1, 1]} : vector<1x128xf32> to vector<1x32xf32>
    %397 = vector.broadcast %396 : vector<1x32xf32> to vector<8x32xf32>
    %398 = arith.addf %395, %397 : vector<8x32xf32>
    %399 = arith.negf %398 : vector<8x32xf32>
    %400 = math.exp %399 : vector<8x32xf32>
    %cst_125 = arith.constant 1.000000e+00 : f32
    %401 = vector.broadcast %cst_125 : f32 to vector<8x32xf32>
    %402 = arith.addf %401, %400 : vector<8x32xf32>
    %403 = arith.divf %401, %402 : vector<8x32xf32>
    %404 = arith.mulf %398, %403 : vector<8x32xf32>
    %405 = arith.truncf %404 : vector<8x32xf32> to vector<8x32xbf16>
    %406 = vector.extract_strided_slice %392 {offsets = [0, 0], sizes = [32, 32], strides = [1, 1]} : vector<128x32xbf16> to vector<32x32xbf16>
    %cst_126 = arith.constant dense<0.000000e+00> : vector<8x32xf32>
    %407 = tpu.matmul %405, %406, %cst_126 {dimension_numbers = #tpu.dot_dimension_numbers<[1], [0], [0], [1], [0, 0, 1, 1], [], []>} : vector<8x32xbf16>, vector<32x32xbf16>, vector<8x32xf32> -> vector<8x32xf32>
    %408 = arith.addf %393, %407 : vector<8x32xf32>
    %409 = vector.extract_strided_slice %390 {offsets = [0, 32], sizes = [32, 32], strides = [1, 1]} : vector<32x128xbf16> to vector<32x32xbf16>
    %cst_127 = arith.constant dense<0.000000e+00> : vector<8x32xf32>
    %410 = tpu.matmul %389, %409, %cst_127 {dimension_numbers = #tpu.dot_dimension_numbers<[1], [0], [0], [1], [0, 0, 1, 1], [], []>} : vector<8x32xbf16>, vector<32x32xbf16>, vector<8x32xf32> -> vector<8x32xf32>
    %411 = vector.extract_strided_slice %391 {offsets = [0, 32], sizes = [1, 32], strides = [1, 1]} : vector<1x128xf32> to vector<1x32xf32>
    %412 = vector.broadcast %411 : vector<1x32xf32> to vector<8x32xf32>
    %413 = arith.addf %410, %412 : vector<8x32xf32>
    %414 = arith.negf %413 : vector<8x32xf32>
    %415 = math.exp %414 : vector<8x32xf32>
    %cst_128 = arith.constant 1.000000e+00 : f32
    %416 = vector.broadcast %cst_128 : f32 to vector<8x32xf32>
    %417 = arith.addf %416, %415 : vector<8x32xf32>
    %418 = arith.divf %416, %417 : vector<8x32xf32>
    %419 = arith.mulf %413, %418 : vector<8x32xf32>
    %420 = arith.truncf %419 : vector<8x32xf32> to vector<8x32xbf16>
    %421 = vector.extract_strided_slice %392 {offsets = [32, 0], sizes = [32, 32], strides = [1, 1]} : vector<128x32xbf16> to vector<32x32xbf16>
    %cst_129 = arith.constant dense<0.000000e+00> : vector<8x32xf32>
    %422 = tpu.matmul %420, %421, %cst_129 {dimension_numbers = #tpu.dot_dimension_numbers<[1], [0], [0], [1], [0, 0, 1, 1], [], []>} : vector<8x32xbf16>, vector<32x32xbf16>, vector<8x32xf32> -> vector<8x32xf32>
    %423 = arith.addf %408, %422 : vector<8x32xf32>
    %424 = vector.extract_strided_slice %390 {offsets = [0, 64], sizes = [32, 32], strides = [1, 1]} : vector<32x128xbf16> to vector<32x32xbf16>
    %cst_130 = arith.constant dense<0.000000e+00> : vector<8x32xf32>
    %425 = tpu.matmul %389, %424, %cst_130 {dimension_numbers = #tpu.dot_dimension_numbers<[1], [0], [0], [1], [0, 0, 1, 1], [], []>} : vector<8x32xbf16>, vector<32x32xbf16>, vector<8x32xf32> -> vector<8x32xf32>
    %426 = vector.extract_strided_slice %391 {offsets = [0, 64], sizes = [1, 32], strides = [1, 1]} : vector<1x128xf32> to vector<1x32xf32>
    %427 = vector.broadcast %426 : vector<1x32xf32> to vector<8x32xf32>
    %428 = arith.addf %425, %427 : vector<8x32xf32>
    %429 = arith.negf %428 : vector<8x32xf32>
    %430 = math.exp %429 : vector<8x32xf32>
    %cst_131 = arith.constant 1.000000e+00 : f32
    %431 = vector.broadcast %cst_131 : f32 to vector<8x32xf32>
    %432 = arith.addf %431, %430 : vector<8x32xf32>
    %433 = arith.divf %431, %432 : vector<8x32xf32>
    %434 = arith.mulf %428, %433 : vector<8x32xf32>
    %435 = arith.truncf %434 : vector<8x32xf32> to vector<8x32xbf16>
    %436 = vector.extract_strided_slice %392 {offsets = [64, 0], sizes = [32, 32], strides = [1, 1]} : vector<128x32xbf16> to vector<32x32xbf16>
    %cst_132 = arith.constant dense<0.000000e+00> : vector<8x32xf32>
    %437 = tpu.matmul %435, %436, %cst_132 {dimension_numbers = #tpu.dot_dimension_numbers<[1], [0], [0], [1], [0, 0, 1, 1], [], []>} : vector<8x32xbf16>, vector<32x32xbf16>, vector<8x32xf32> -> vector<8x32xf32>
    %438 = arith.addf %423, %437 : vector<8x32xf32>
    %439 = vector.extract_strided_slice %390 {offsets = [0, 96], sizes = [32, 32], strides = [1, 1]} : vector<32x128xbf16> to vector<32x32xbf16>
    %cst_133 = arith.constant dense<0.000000e+00> : vector<8x32xf32>
    %440 = tpu.matmul %389, %439, %cst_133 {dimension_numbers = #tpu.dot_dimension_numbers<[1], [0], [0], [1], [0, 0, 1, 1], [], []>} : vector<8x32xbf16>, vector<32x32xbf16>, vector<8x32xf32> -> vector<8x32xf32>
    %441 = vector.extract_strided_slice %391 {offsets = [0, 96], sizes = [1, 32], strides = [1, 1]} : vector<1x128xf32> to vector<1x32xf32>
    %442 = vector.broadcast %441 : vector<1x32xf32> to vector<8x32xf32>
    %443 = arith.addf %440, %442 : vector<8x32xf32>
    %444 = arith.negf %443 : vector<8x32xf32>
    %445 = math.exp %444 : vector<8x32xf32>
    %cst_134 = arith.constant 1.000000e+00 : f32
    %446 = vector.broadcast %cst_134 : f32 to vector<8x32xf32>
    %447 = arith.addf %446, %445 : vector<8x32xf32>
    %448 = arith.divf %446, %447 : vector<8x32xf32>
    %449 = arith.mulf %443, %448 : vector<8x32xf32>
    %450 = arith.truncf %449 : vector<8x32xf32> to vector<8x32xbf16>
    %451 = vector.extract_strided_slice %392 {offsets = [96, 0], sizes = [32, 32], strides = [1, 1]} : vector<128x32xbf16> to vector<32x32xbf16>
    %cst_135 = arith.constant dense<0.000000e+00> : vector<8x32xf32>
    %452 = tpu.matmul %450, %451, %cst_135 {dimension_numbers = #tpu.dot_dimension_numbers<[1], [0], [0], [1], [0, 0, 1, 1], [], []>} : vector<8x32xbf16>, vector<32x32xbf16>, vector<8x32xf32> -> vector<8x32xf32>
    %453 = arith.addf %438, %452 : vector<8x32xf32>
    %454 = arith.addf %364, %453 : vector<8x32xf32>
    %c15 = arith.constant 15 : index
    %c0_136 = arith.constant 0 : index
    %455 = vector.load %arg16[%c15, %c0_136] : memref<18x32xf32, #tpu.memory_space<vmem>>, vector<1x32xf32>
    %456 = vector.broadcast %455 : vector<1x32xf32> to vector<8x32xf32>
    %457 = arith.addf %454, %456 : vector<8x32xf32>
    %458 = arith.addf %364, %457 : vector<8x32xf32>
    %cst_137 = arith.constant dense<0.000000e+00> : vector<8xf32>
    %459 = vector.multi_reduction <add>, %458, %cst_137 [1] : vector<8x32xf32> to vector<8xf32>
    %460 = vector.shape_cast %459 : vector<8xf32> to vector<8x1xf32>
    %cst_138 = arith.constant 3.200000e+01 : f32
    %461 = vector.broadcast %cst_138 : f32 to vector<8x1xf32>
    %462 = arith.divf %460, %461 : vector<8x1xf32>
    %463 = vector.broadcast %462 : vector<8x1xf32> to vector<8x32xf32>
    %464 = arith.subf %458, %463 : vector<8x32xf32>
    %465 = arith.mulf %464, %464 : vector<8x32xf32>
    %cst_139 = arith.constant dense<0.000000e+00> : vector<8xf32>
    %466 = vector.multi_reduction <add>, %465, %cst_139 [1] : vector<8x32xf32> to vector<8xf32>
    %467 = vector.shape_cast %466 : vector<8xf32> to vector<8x1xf32>
    %cst_140 = arith.constant 3.200000e+01 : f32
    %468 = vector.broadcast %cst_140 : f32 to vector<8x1xf32>
    %469 = arith.divf %467, %468 : vector<8x1xf32>
    %470 = vector.broadcast %462 : vector<8x1xf32> to vector<8x32xf32>
    %471 = arith.subf %458, %470 : vector<8x32xf32>
    %cst_141 = arith.constant 9.99999974E-6 : f32
    %472 = vector.broadcast %cst_141 : f32 to vector<8x1xf32>
    %473 = arith.addf %469, %472 : vector<8x1xf32>
    %474 = math.rsqrt %473 : vector<8x1xf32>
    %475 = vector.broadcast %474 : vector<8x1xf32> to vector<8x32xf32>
    %476 = arith.mulf %471, %475 : vector<8x32xf32>
    %c16 = arith.constant 16 : index
    %c0_142 = arith.constant 0 : index
    %477 = vector.load %arg16[%c16, %c0_142] : memref<18x32xf32, #tpu.memory_space<vmem>>, vector<1x32xf32>
    %478 = vector.broadcast %477 : vector<1x32xf32> to vector<8x32xf32>
    %479 = arith.mulf %476, %478 : vector<8x32xf32>
    %c17 = arith.constant 17 : index
    %c0_143 = arith.constant 0 : index
    %480 = vector.load %arg16[%c17, %c0_143] : memref<18x32xf32, #tpu.memory_space<vmem>>, vector<1x32xf32>
    %481 = vector.broadcast %480 : vector<1x32xf32> to vector<8x32xf32>
    %482 = arith.addf %479, %481 : vector<8x32xf32>
    %c0_144 = arith.constant 0 : index
    %c0_145 = arith.constant 0 : index
    %c0_146 = arith.constant 0 : index
    %483 = vector.load %arg17[%c0_144, %c0_145, %c0_146] : memref<1x8x32xf32, #tpu.memory_space<vmem>>, vector<1x8x32xf32>
    %484 = vector.shape_cast %483 : vector<1x8x32xf32> to vector<8x32xf32>
    %485 = vector.shape_cast %482 : vector<8x32xf32> to vector<1x8x32xf32>
    tpu.vector_store %arg17[%c0_144, %c0_145, %c0_146], %485 {strides = array<i32>} : memref<1x8x32xf32, #tpu.memory_space<vmem>>, vector<1x8x32xf32>,
    return
  }
  func.func @transform_0(%arg0: i32) -> (i32, i32, i32) {
    %c0_i32 = arith.constant 0 : i32
    %c0_i32_0 = arith.constant 0 : i32
    %c0_i32_1 = arith.constant 0 : i32
    return %arg0, %c0_i32, %c0_i32_0 : i32, i32, i32
  }
  func.func @transform_1(%arg0: i32) -> (i32, i32) {
    %c0_i32 = arith.constant 0 : i32
    %c0_i32_0 = arith.constant 0 : i32
    %c0_i32_1 = arith.constant 0 : i32
    return %c0_i32, %c0_i32_0 : i32, i32
  }
  func.func @transform_2(%arg0: i32) -> (i32, i32) {
    %c0_i32 = arith.constant 0 : i32
    %c0_i32_0 = arith.constant 0 : i32
    %c0_i32_1 = arith.constant 0 : i32
    return %c0_i32, %c0_i32_0 : i32, i32
  }
  func.func @transform_3(%arg0: i32) -> (i32, i32) {
    %c0_i32 = arith.constant 0 : i32
    %c0_i32_0 = arith.constant 0 : i32
    %c0_i32_1 = arith.constant 0 : i32
    return %c0_i32, %c0_i32_0 : i32, i32
  }
  func.func @transform_4(%arg0: i32) -> (i32, i32) {
    %c0_i32 = arith.constant 0 : i32
    %c0_i32_0 = arith.constant 0 : i32
    %c0_i32_1 = arith.constant 0 : i32
    return %c0_i32, %c0_i32_0 : i32, i32
  }
  func.func @transform_5(%arg0: i32) -> (i32, i32) {
    %c0_i32 = arith.constant 0 : i32
    %c0_i32_0 = arith.constant 0 : i32
    %c0_i32_1 = arith.constant 0 : i32
    return %c0_i32, %c0_i32_0 : i32, i32
  }
  func.func @transform_6(%arg0: i32) -> (i32, i32) {
    %c0_i32 = arith.constant 0 : i32
    %c0_i32_0 = arith.constant 0 : i32
    %c0_i32_1 = arith.constant 0 : i32
    return %c0_i32, %c0_i32_0 : i32, i32
  }
  func.func @transform_7(%arg0: i32) -> (i32, i32) {
    %c0_i32 = arith.constant 0 : i32
    %c0_i32_0 = arith.constant 0 : i32
    %c0_i32_1 = arith.constant 0 : i32
    return %c0_i32, %c0_i32_0 : i32, i32
  }
  func.func @transform_8(%arg0: i32) -> (i32, i32) {
    %c0_i32 = arith.constant 0 : i32
    %c0_i32_0 = arith.constant 0 : i32
    %c0_i32_1 = arith.constant 0 : i32
    return %c0_i32, %c0_i32_0 : i32, i32
  }
  func.func @transform_9(%arg0: i32) -> (i32, i32) {
    %c0_i32 = arith.constant 0 : i32
    %c0_i32_0 = arith.constant 0 : i32
    %c0_i32_1 = arith.constant 0 : i32
    return %c0_i32, %c0_i32_0 : i32, i32
  }
  func.func @transform_10(%arg0: i32) -> (i32, i32) {
    %c0_i32 = arith.constant 0 : i32
    %c0_i32_0 = arith.constant 0 : i32
    %c0_i32_1 = arith.constant 0 : i32
    return %c0_i32, %c0_i32_0 : i32, i32
  }
  func.func @transform_11(%arg0: i32) -> (i32, i32) {
    %c0_i32 = arith.constant 0 : i32
    %c0_i32_0 = arith.constant 0 : i32
    %c0_i32_1 = arith.constant 0 : i32
    return %c0_i32, %c0_i32_0 : i32, i32
  }
  func.func @transform_12(%arg0: i32) -> (i32, i32) {
    %c0_i32 = arith.constant 0 : i32
    %c0_i32_0 = arith.constant 0 : i32
    %c0_i32_1 = arith.constant 0 : i32
    return %c0_i32, %c0_i32_0 : i32, i32
  }
  func.func @transform_13(%arg0: i32) -> (i32, i32) {
    %c0_i32 = arith.constant 0 : i32
    %c0_i32_0 = arith.constant 0 : i32
    %c0_i32_1 = arith.constant 0 : i32
    return %c0_i32, %c0_i32_0 : i32, i32
  }
  func.func @transform_14(%arg0: i32) -> (i32, i32) {
    %c0_i32 = arith.constant 0 : i32
    %c0_i32_0 = arith.constant 0 : i32
    %c0_i32_1 = arith.constant 0 : i32
    return %c0_i32, %c0_i32_0 : i32, i32
  }
  func.func @transform_15(%arg0: i32) -> (i32, i32) {
    %c0_i32 = arith.constant 0 : i32
    %c0_i32_0 = arith.constant 0 : i32
    %c0_i32_1 = arith.constant 0 : i32
    return %c0_i32, %c0_i32_0 : i32, i32
  }
  func.func @transform_16(%arg0: i32) -> (i32, i32, i32) {
    %c0_i32 = arith.constant 0 : i32
    %c0_i32_0 = arith.constant 0 : i32
    %c0_i32_1 = arith.constant 0 : i32
    return %arg0, %c0_i32, %c0_i32_0 : i32, i32, i32
  }
}

</mosaic_0001>

<bundles_post_ra>
// kernel: tpu_custom_call.1
= control target key start
LH: loop header
LB: loop body
LE: loop exit
PB: predicated region body
PF: predicated region fallthrough
CT: control target
= control target key end

     0   :  { %s3564_s0 = inlined_call_operand.vmem [shape: f32[2,8,32], index: 0, kind: input, shape index: {}]   ;;  %s3565_s1 = inlined_call_operand.vmem [shape: bf16[32,128], index: 1, kind: input, shape index: {}]   ;;  %s3566_s2 = inlined_call_operand.vmem [shape: f32[1,128], index: 2, kind: input, shape index: {}]   ;;  %s3567_s3 = inlined_call_operand.vmem [shape: bf16[128,32], index: 3, kind: input, shape index: {}]   ;;  %s3568_s4 = inlined_call_operand.vmem [shape: bf16[32,128], index: 4, kind: input, shape index: {}]   ;;  %s3569_s5 = inlined_call_operand.hbm [shape: f32[1,128], index: 5, kind: input, shape index: {}]   ;;  %s3570_s6 = inlined_call_operand.vmem [shape: bf16[128,32], index: 6, kind: input, shape index: {}]   ;;  %s3571_s7 = inlined_call_operand.vmem [shape: bf16[32,96], index: 7, kind: input, shape index: {}]   ;;  %s3572_s8 = inlined_call_operand.vmem [shape: bf16[32,32], index: 8, kind: input, shape index: {}]   ;;  %s3573_s9 = inlined_call_operand.hbm [shape: f32[8,8], index: 9, kind: input, shape index: {}]   ;;  %s3574_s10 = inlined_call_operand.hbm [shape: f32[8,8], index: 10, kind: input, shape index: {}]   ;;  %s3575_s11 = inlined_call_operand.vmem [shape: bf16[32,64], index: 11, kind: input, shape index: {}]   ;;  %s3576_s12 = inlined_call_operand.vmem [shape: f32[1,64], index: 12, kind: input, shape index: {}]   ;;  %s3577_s13 = inlined_call_operand.vmem [shape: f32[32,32], index: 13, kind: input, shape index: {}]   ;;  %s3578_s14 = inlined_call_operand.hbm [shape: bf16[32,32], index: 14, kind: input, shape index: {}]   ;;  %s3579_s15 = inlined_call_operand.vmem [shape: f32[18,32], index: 15, kind: input, shape index: {}]   ;;  %s3580_s16 = inlined_call_operand.hbm [shape: f32[2,8,32], index: 16, kind: output, shape index: {}]  }
   0x1   :  { %3589 = sst [smem:[#allocation22_spill]] %s3564_s0 }
   0x2   :  { %3590 = sst [smem:[#allocation23_spill]] %s3569_s5 }
   0x3   :  { %3591 = sst [smem:[#allocation24_spill]] %s3573_s9 }
   0x4   :  { %3592 = sst [smem:[#allocation25_spill]] %s3574_s10 }
   0x5   :  { %21 = vsyncpa [#allocation3], 0 }
   0x6   :  { %22 = vsyncpa [#allocation6], 0 }
   0x7   :  { %23 = vsyncpa [#allocation9], 0 }
   0x8   :  { %24 = vsyncpa [#allocation4], 0 }
   0x9   :  { %26 = vsyncpa [#allocation4 + $0x1], 0  ;;  %s3007_s21 = smov 0   ;;  %s3009_s22 = smov 0  }
   0xa   :  { %s3011_s23 = smov 0   ;;  %s3013_s24 = smov 0  }
   0xb LB: > { %3593 = sst [smem:[#allocation15_spill]] %s2877_s21  ;;  %s3028_s25 = sadd.s32 4294967295, %s2889_s24   ;;  %s2889_s24 = sphi %s3013_s24, %s3612_s24   ;;  %s2885_s23 = sphi %s3011_s23, %s3614_s23   ;;  %s2881_s22 = sphi %s3009_s22, %s3616_s22   ;;  %s2877_s21 = sphi %s3007_s21, %s3615_s21  }
   0xc   : > { %3594 = sst [smem:[#allocation16_spill]] %s2885_s23  ;;  %s2294_s26 = sadd.s32 4294967294, %s2889_s24  }
   0xd   : > { %3595 = sst [smem:[#allocation17_spill]] %s2889_s24  ;;  %s3032_s27 = sadd.s32 1, %s2889_s24  }
   0xe   : > { %3596 = sst [smem:[#allocation18_spill]] %s3032_s27  ;;  %s380_s28 = sadd.s32 1, %s2885_s23 }
   0xf   : > { %s377_s29 = ssub.s32 %s2889_s24, %s3032_s27  ;;  %p390_p0 = scmp.ne.s32.totalorder %s2885_s23, %s2881_s22 }
  0x10   : > { %p378_p1 = scmp.eq.s32.totalorder %s377_s29, 0  ;;  %p391_p2 = scmp.eq.s32.totalorder %s3028_s25, 1 }
  0x11   : > { %p396_p3 = scmp.ne.s32.totalorder %s2881_s22, %s2877_s21  ;;  %p397_p4 = scmp.eq.s32.totalorder %s2294_s26, 1 }
  0x12   : > { %s3043_s30 = scalar_select %p378_p1, %s2885_s23, %s380_s28  }
  0x13   : > { %p3045_p5 = por %p391_p2, %p390_p0  ;;  %p3049_p6 = por %p397_p4, %p396_p3 }
  0x14   : > { %3597 = sst [smem:[#allocation19_spill]] %s3043_s30  ;;  %p2295_p7 = scmp.ge.s32.totalorder %s2889_s24, 1 }
  0x15   : > { %s3598_s0 = scalar_select %p3045_p5, 1, 0 }
  0x16   : > { %s3600_s17 = scalar_select %p3049_p6, 1, 0 }
  0x17   : > { %3599 = sst [smem:[#allocation20_spill]] %s3598_s0  ;;  %p404_p8 = scmp.lt.s32.totalorder %s2889_s24, 3 }
  0x18   : > { %3601 = sst [smem:[#allocation21_spill]] %s3600_s17  ;;  %p2522_p9 = scmp.eq.s32.totalorder %s3028_s25, 0 }
  0x19   : > { %p3056_p10 = pnand %p2295_p7, %p404_p8  ;;  %s3603_s9 = sld [smem:[#allocation24_spill]] }
  0x1a   : > { %s2891_s28 = smov [#allocation5]   ;;  %s3604_s5 = sld [smem:[#allocation23_spill]] }
  0x1b   : > { %p2505_p11 = pneg %p3056_p10  ;;  %s451_s29 = sshll.u32 %s2891_s28, 4  ;;  %s452_s29 = int_to_ptr.vmem [resolvable:$true] %s451_s29 }
  0x1c   : > { %s3606_s10 = sld [smem:[#allocation25_spill]]  ;;  %s2892_s21 = smov [#allocation2]  }
  0x1d   : > { %p3070_p12 = pnand %p2522_p9, %p2505_p11  ;;  %s430_s28 = sshll.u32 %s2892_s21, 4  ;;  %s431_s28 = int_to_ptr.vmem [resolvable:$true] %s430_s28 }
  0x1e   : > { %s2893_s24 = smov [#allocation7]   ;;  %s2894_s19 = smov [#allocation8]  }
  0x1f   : > { %s449_s26 = sshll.u32 %s3603_s9, 4  ;;  %s463_s0 = sshll.u32 %s2893_s24, 4  ;;  %s450_s26 = int_to_ptr.hbm [resolvable:$true] %s449_s26  ;;  %s464_s0 = int_to_ptr.vmem [resolvable:$true] %s463_s0 }
  0x20   : > { %s428_s27 = sshll.u32 %s3604_s5, 4  ;;  %s481_s5 = sshll.u32 %s3578_s14, 4  ;;  %s429_s27 = int_to_ptr.hbm [resolvable:$true] %s428_s27  ;;  %s482_s5 = int_to_ptr.hbm [resolvable:$true] %s481_s5 }
  0x21   : > { %2511 = dma.hbm_to_vmem [thread:$0]  (!%p3070_p12), %s450_s26, 128, %s452_s29, [#allocation6]  }
  0x22   : > { %s461_s9 = sshll.u32 %s3606_s10, 4  ;;  %s483_s20 = sshll.u32 %s2894_s19, 4  ;;  %s462_s9 = int_to_ptr.hbm [resolvable:$true] %s461_s9  ;;  %s484_s20 = int_to_ptr.vmem [resolvable:$true] %s483_s20 }
  0x23   : > { %2508 = dma.hbm_to_vmem [thread:$0]  (!%p3070_p12), %s429_s27, 16, %s431_s28, [#allocation3]  }
  0x24   : > { %2514 = dma.hbm_to_vmem [thread:$0]  (!%p3070_p12), %s462_s9, 128, %s464_s0, [#allocation6]  }
  0x25   : > { %s2895_s21 = smov 64   ;;  %s2896_s10 = smov 4  }
  0x26   : > { %2517 = dma.hbm_to_vmem [thread:$0]  (!%p3070_p12), %s482_s5, 256, %s484_s20, [#allocation9], %s2895_s21, %s2895_s21, %s2896_s10  }
  0x27   : > { %509 = sbr.rel (%p3056_p10) target bundleno = 4931 (0x1343), region = 84 }
  0x2c   : > { %2860 = dma.done.wait (%p2522_p9), [#allocation3], 16  }
  0x2d   : > { %2862 = vsyncadd (%p2522_p9), [#allocation3], 4294967280 }
  0x2e   : > { %2864 = dma.done.wait (%p2522_p9), [#allocation6], 256  }
  0x2f   : > { %2866 = vsyncadd (%p2522_p9), [#allocation6], 4294967040 }
  0x30   : > { %2868 = dma.done.wait (%p2522_p9), [#allocation9], 256  }
  0x31   : > { %2870 = vsyncadd (%p2522_p9), [#allocation9], 4294967040  ;;  %p574_p13 = scmp.lt.s32.totalorder %s3028_s25, 1  ;;  %s3607_s27 = sld [smem:[#allocation22_spill]]  ;;  %vm580_vm0 = vcmask 261120   ;;  %v2897_v2 = vmov 32.0  }
  0x32   : > { %2625 = vrcp.f32 %v2897_v2  ;;  %v2462_v3 = vld [vmem:[%s3565_s1 + $0x8] sm:$0xff]  ;;  %v3117_v4 = vld [vmem:[%s3566_s2] ss:$0 sm:$0xff]  ;;  %s2898_s28 = smov 96   ;;  %s2899_s19 = smov 32   ;;  %v2466_v39 = vld [vmem:[%s3567_s3 + $0x18] sm:$0xff] }
  0x33   : > { %s575_s5 = scalar_select %p574_p13, %s3028_s25, 1  ;;  %692 = vrot.lane.b32.xlu1 %v2462_v3, %s2898_s28  ;;  %696 = vrot.lane.b32.xlu2 %v3117_v4, %s2898_s28  ;;  %v2461_v6 = vld [vmem:[%s3565_s1] sm:$0xff]  ;;  %v2464_v40 = vld [vmem:[%s3567_s3 + $0x8] sm:$0xff] }
  0x34   : > { %662 = vmatpush.bf16.msra.mxu0 %v2462_v3  ;;  %s2900_s20 = smov 64   ;;  %v2605_v32 = vld [vmem:[%s3579_s15] ss:$0 sm:$0xff]  ;;  %v2606_v35 = vld [vmem:[%s3579_s15 + $0x1] ss:$0 sm:$0xff]  ;;  %754 = vmatpush.bf16.msra.mxu2 %v2466_v39  ;;  %v2465_v41 = vld [vmem:[%s3567_s3 + $0x10] sm:$0xff] }
  0x35   : > { %s2307_s9 = sshll.u32 %s575_s5, 3  ;;  %782 = vmatpush.bf16.msra.mxu3 %v2464_v40  ;;  %v2463_v42 = vld [vmem:[%s3567_s3] sm:$0xff]  ;;  %v2468_v52 = vld [vmem:[%s3567_s3 + $0x28] sm:$0xff]  ;;  %s2901_s24 = smov 88  }
  0x36   : > { %v2467_v57 = vld [vmem:[%s3567_s3 + $0x20] sm:$0xff]  ;;  %s2904_s17 = smov 8   ;;  %s2905_s18 = smov 4  }
  0x37   : > { %s577_s0 = scalar_lea.vmem %s3607_s27, %s2307_s9  ;;  %s2902_s27 = smov 80  }
  0x38   : > { %v3107_v0 = vld [vmem:[%s577_s0] sm:$0xff]  ;;  %v2626_v5 = vpop.eup %2625  ;;  %663 = vmatpush.bf16.msra.mxu0 %v2461_v6  ;;  %755 = vmatpush.bf16.msra.mxu2 %v2465_v41  ;;  %s2903_s0 = smov 112   ;;  %s2906_s26 = smov 28  }
  0x39   : > { %v581_v1 = vsel %vm580_vm0, %v3107_v0, 0.0  ;;  %v585_v7 = vmul.f32 32.0, %v2626_v5  ;;  %vm589_vm1 = vweird.f32 %v2626_v5  ;;  %783 = vmatpush.bf16.msra.mxu3 %v2463_v42  ;;  %s2907_s29 = smov 120   ;;  %s2908_s23 = smov 124  }
  0x3a   : > { %582 = vadd.xlane.f32.xlu0 %v581_v1  ;;  %s2909_s30 = smov 72   ;;  %s2910_s21 = smov 104  }
  0x3b   : > { %v586_v8 = vsub.f32 1.0, %v585_v7  ;;  %690 = vrot.lane.b32.xlu1 %v2461_v6, %s2898_s28  ;;  %863 = vrot.lane.b32.xlu2 %v2462_v3, %s2899_s19  ;;  %s2911_s5 = smov 40   ;;  %s2912_s9 = smov 36  }
  0x3c   : > { %s2913_s10 = smov 56  }
  0x3d   : > { %v587_v9 = vmul.f32 %v2626_v5, %v586_v8 }
  0x3f   : > { %v588_v10 = vadd.f32 %v2626_v5, %v587_v9 }
  0x41   : > { %v3129_v11 = vsel %vm589_vm1, %v2626_v5, %v588_v10 }
  0x43   : > { %791 = vrot.lane.b32.xlu1 %v2462_v3, %s2900_s20  ;;  %789 = vrot.lane.b32.xlu2 %v2461_v6, %s2900_s20 }
  0x4b   : > { %795 = vrot.lane.b32.xlu2 %v3117_v4, %s2900_s20  ;;  %867 = vrot.lane.b32.xlu1 %v3117_v4, %s2899_s19 }
  0x8d   : > { %v697_v18 = vpop.permute.xlu2 %696 }
  0x95   : > { %v864_v20 = vpop.permute.xlu2 %863 }
  0x96   : > { %876 = vmatpush.bf16.msrb.mxu2 %v864_v20 }
  0x9d   : > { %v790_v25 = vpop.permute.xlu2 %789 }
  0xa5   : > { %v693_v17 = vpop.permute.xlu1 %692  ;;  %v796_v56 = vpop.permute.xlu2 %795 }
  0xa6   : > { %705 = vmatpush.bf16.msra.mxu1 %v693_v17 }
  0xad   : > { %v583_v12 = vpop.xlane.xlu0 %582  ;;  %v691_v19 = vpop.permute.xlu1 %690 }
  0xae   : > { %v591_v13 = vmul.f32 %v3129_v11, %v583_v12  ;;  %706 = vmatpush.bf16.msra.mxu1 %v691_v19 }
  0xb0   : > { %v592_v14 = vsub.f32 %v3107_v0, %v591_v13 }
  0xb2   : > { %v593_v15 = vmul.f32 %v592_v14, %v592_v14  ;;  %853 = vmatpush.bf16.msrb.mxu1 %v2468_v52 }
  0xb4   : > { %v594_v16 = vsel %vm580_vm0, %v593_v15, 0.0 }
  0xb5   : > { %595 = vadd.xlane.f32.xlu0 %v594_v16  ;;  %v792_v24 = vpop.permute.xlu1 %791 }
  0xb6   : > { %804 = vmatpush.bf16.msrb.mxu0 %v792_v24  ;;  %854 = vmatpush.bf16.msrb.mxu1 %v2467_v57 }
  0xba   : > { %805 = vmatpush.bf16.msrb.mxu0 %v790_v25 }
  0xc9   : > { %861 = vrot.lane.b32.xlu0 %v2461_v6, %s2899_s19 }
 0x128   : > { %v596_v21 = vpop.xlane.xlu0 %595 }
 0x129   : > { %v597_v22 = vmul.f32 %v596_v21, %v3129_v11 }
 0x12b   : > { %v598_v23 = vadd.f32 1e-05, %v597_v22 }
 0x12d   : > { %2627 = vrsqrt.f32 %v598_v23  ;;  %vm605_vm3 = vweird.f32 %v598_v23 }
 0x133   : > { %v2628_v26 = vpop.eup %2627 }
 0x134   : > { %v600_v27 = vmul.f32 %v2628_v26, %v598_v23  ;;  %vm606_vm2 = vweird.f32 %v2628_v26 }
 0x135   : > { %vm607_vm4 = vmor %vm605_vm3, %vm606_vm2 }
 0x136   : > { %v601_v28 = vmul.f32 %v2628_v26, %v600_v27 }
 0x138   : > { %v602_v29 = vmul.f32 0.5, %v601_v28 }
 0x13a   : > { %v603_v30 = vsub.f32 1.5, %v602_v29 }
 0x13b   : > { %v862_v59 = vpop.permute.xlu0 %861 }
 0x13c   : > { %v604_v31 = vmul.f32 %v2628_v26, %v603_v30  ;;  %877 = vmatpush.bf16.msrb.mxu2 %v862_v59 }
 0x13e   : > { %v608_v33 = vsel %vm607_vm4, %v2628_v26, %v604_v31 }
 0x13f   : > { %v609_v34 = vmul.f32 %v608_v33, %v592_v14 }
 0x141   : > { %v612_v36 = vmul.f32 %v2605_v32, %v609_v34 }
 0x143   : > { %v615_v37 = vadd.f32 %v2606_v35, %v612_v36 }
 0x145   : > { %v3146_v38 = vpack.c.bf16 %v615_v37, %v615_v37 }
 0x147   : > { %2316 = vmatmul.msk.bf16.vlgmr.msra.gmra.mxu0 %vm580_vm0, %v3146_v38  ;;  %2318 = vmatmul.msk.bf16.vlgmr.msra.gmra.mxu1 %vm580_vm0, %v3146_v38 }
 0x157   : > { %2338 = vmatmul.msk.bf16.vlgmr.msrb.gmra.mxu0 %vm580_vm0, %v3146_v38 }
 0x1c4   : > { %v665_v43 = vpop.f32.mrf.mxu0  ;;  %v708_v44 = vpop.f32.mrf.mxu1 }
 0x1c5   : > { %v666_v45 = vadd.f32 %v3117_v4, %v665_v43  ;;  %v709_v46 = vadd.f32 %v708_v44, %v697_v18 }
 0x1c7   : > { %v2317_v47 = vmul.f32 -1.442695, %v666_v45  ;;  %v2319_v48 = vmul.f32 -1.442695, %v709_v46 }
 0x1c9   : > { %2629 = vpow2.f32 %v2317_v47  ;;  %v2470_v47 = vld [vmem:[%s3567_s3 + $0x38] sm:$0xff] }
 0x1ca   : > { %2631 = vpow2.f32 %v2319_v48  ;;  %925 = vmatpush.bf16.msrb.mxu3 %v2470_v47  ;;  %v868_v48 = vpop.permute.xlu1 %867 }
 0x1cc   : > { %v667_v49 = vpop.f32.mrf.mxu0  ;;  %v710_v50 = vpop.f32.mrf.mxu1 }
 0x1cd   : > { %v2469_v49 = vld [vmem:[%s3567_s3 + $0x30] sm:$0xff] }
 0x1ce   : > { %926 = vmatpush.bf16.msrb.mxu3 %v2469_v49 }
 0x1cf   : > { %v2630_v51 = vpop.eup %2629 }
 0x1d0   : > { %v2632_v53 = vpop.eup %2631  ;;  %v672_v54 = vadd.f32 1.0, %v2630_v51 }
 0x1d1   : > { %v715_v55 = vadd.f32 1.0, %v2632_v53 }
 0x1d2   : > { %2633 = vrcp.f32 %v672_v54  ;;  %v684_v4 = vand.u32 2147483648, %v672_v54  ;;  %v682_v8 = vand.u32 2147483647, %v672_v54  ;;  %vm678_vm7 = vweird.f32 %v672_v54 }
 0x1d3   : > { %2635 = vrcp.f32 %v715_v55  ;;  %v727_v9 = vand.u32 2147483648, %v715_v55  ;;  %v725_v12 = vand.u32 2147483647, %v715_v55  ;;  %vm721_vm9 = vweird.f32 %v715_v55 }
 0x1d4   : > { %v807_v58 = vpop.f32.mrf.mxu0  ;;  %v685_v15 = vor.u32 1.1754944e-38, %v684_v4  ;;  %vm683_vm10 = vcmp.eq.f32.partialorder %v682_v8, 8.507059e+37 }
 0x1d5   : > { %v808_v60 = vadd.f32 %v807_v58, %v796_v56  ;;  %v728_v19 = vor.u32 1.1754944e-38, %v727_v9  ;;  %vm726_vm12 = vcmp.eq.f32.partialorder %v725_v12, 8.507059e+37 }
 0x1d7   : > { %v2339_v61 = vmul.f32 -1.442695, %v808_v60 }
 0x1d8   : > { %v2634_v62 = vpop.eup %2633 }
 0x1d9   : > { %v2636_v63 = vpop.eup %2635  ;;  %v674_v1 = vmul.f32 %v2634_v62, %v672_v54  ;;  %2637 = vpow2.f32 %v2339_v61  ;;  %vm679_vm5 = vweird.f32 %v2634_v62 }
 0x1da   : > { %v717_v2 = vmul.f32 %v2636_v63, %v715_v55  ;;  %vm722_vm6 = vweird.f32 %v2636_v63  ;;  %vm680_vm8 = vmor %vm678_vm7, %vm679_vm5 }
 0x1db   : > { %v675_v3 = vsub.f32 1.0, %v674_v1  ;;  %vm723_vm11 = vmor %vm721_vm9, %vm722_vm6  ;;  %vm1008_vm9 = vcmask 1047616  }
 0x1dc   : > { %v718_v5 = vsub.f32 1.0, %v717_v2  ;;  %v809_v6 = vpop.f32.mrf.mxu0 }
 0x1dd   : > { %v676_v7 = vmul.f32 %v2634_v62, %v675_v3 }
 0x1de   : > { %v719_v10 = vmul.f32 %v2636_v63, %v718_v5 }
 0x1df   : > { %v2638_v13 = vpop.eup %2637  ;;  %v677_v14 = vadd.f32 %v2634_v62, %v676_v7  ;;  %v2607_v7 = vld [vmem:[%s3579_s15 + $0x2] ss:$0 sm:$0xff] }
 0x1e0   : > { %v720_v16 = vadd.f32 %v2636_v63, %v719_v10  ;;  %v814_v17 = vadd.f32 1.0, %v2638_v13 }
 0x1e1   : > { %v681_v18 = vsel %vm680_vm8, %v2634_v62, %v677_v14 }
 0x1e2   : > { %v686_v20 = vsel %vm683_vm10, %v685_v15, %v681_v18  ;;  %v724_v21 = vsel %vm723_vm11, %v2636_v63, %v720_v16  ;;  %2639 = vrcp.f32 %v814_v17  ;;  %v826_v30 = vand.u32 2147483648, %v814_v17 }
 0x1e3   : > { %v688_v22 = vmul.f32 %v686_v20, %v666_v45  ;;  %v729_v23 = vsel %vm726_vm12, %v728_v19, %v724_v21  ;;  %v824_v32 = vand.u32 2147483647, %v814_v17  ;;  %vm820_vm14 = vweird.f32 %v814_v17  ;;  %v2472_v19 = vld [vmem:[%s3571_s7 + $0x8] sm:$0xff] }
 0x1e4   : > { %v731_v24 = vmul.f32 %v729_v23, %v709_v46  ;;  %v827_v34 = vor.u32 1.1754944e-38, %v826_v30  ;;  %992 = vmatpush.bf16.msra.mxu0 %v2472_v19  ;;  %v3203_v20 = vld [vmem:[#allocation5] sm:$0xff]  ;;  %vm1051_vm10 = vcmask 64512   ;;  %vm1090_vm11 = vcmask 1043456  }
 0x1e5   : > { %v689_v25 = vpack.c.bf16 %v688_v22, %v688_v22  ;;  %vm825_vm1 = vcmp.eq.f32.partialorder %v824_v32, 8.507059e+37  ;;  %v2608_v30 = vld [vmem:[%s3579_s15 + $0x3] ss:$0 sm:$0xff] }
 0x1e6   : > { %v732_v26 = vpack.c.bf16 %v731_v24, %v731_v24 }
 0x1e7   : > { %2337 = vmatmul.msk.bf16.vlgmr.msra.gmra.mxu3 %vm580_vm0, %v689_v25 }
 0x1e8   : > { %v2640_v27 = vpop.eup %2639  ;;  %2328 = vmatmul.msk.bf16.vlgmr.msra.gmra.mxu2 %vm580_vm0, %v732_v26 }
 0x1e9   : > { %v816_v28 = vmul.f32 %v2640_v27, %v814_v17  ;;  %vm821_vm13 = vweird.f32 %v2640_v27 }
 0x1ea   : > { %vm822_vm15 = vmor %vm820_vm14, %vm821_vm13 }
 0x1eb   : > { %v817_v29 = vsub.f32 1.0, %v816_v28 }
 0x1ed   : > { %v818_v31 = vmul.f32 %v2640_v27, %v817_v29 }
 0x1ef   : > { %v819_v33 = vadd.f32 %v2640_v27, %v818_v31 }
 0x1f1   : > { %v823_v35 = vsel %vm822_vm15, %v2640_v27, %v819_v33  ;;  %v2609_v33 = vld [vmem:[%s3579_s15 + $0x4] ss:$0 sm:$0xff] }
 0x1f2   : > { %v828_v36 = vsel %vm825_vm1, %v827_v34, %v823_v35 }
 0x1f3   : > { %v830_v37 = vmul.f32 %v828_v36, %v808_v60 }
 0x1f5   : > { %v831_v39 = vpack.c.bf16 %v830_v37, %v830_v37 }
 0x1f7   : > { %2348 = vmatmul.msk.bf16.vlgmr.msrb.gmra.mxu1 %vm580_vm0, %v831_v39 }
 0x1f8   : > { %2349 = vmatmul.msk.bf16.vlgmr.msrb.gmra.mxu2 %vm580_vm0, %v3146_v38 }
 0x26a   : > { %v785_v40 = vpop.f32.mrf.mxu3 }
 0x26b   : > { %v757_v41 = vpop.f32.mrf.mxu2 }
 0x26c   : > { %v786_v42 = vadd.f32 %v785_v40, %v757_v41 }
 0x272   : > { %v787_v43 = vpop.f32.mrf.mxu3 }
 0x273   : > { %v759_v44 = vpop.f32.mrf.mxu2 }
 0x274   : > { %v856_v45 = vpop.f32.mrf.mxu1 }
 0x275   : > { %v860_v46 = vadd.f32 %v856_v45, %v786_v42  ;;  %v1001_v45 = vld [vmem:[#allocation7] sm:$0xff] }
 0x27b   : > { %v879_v50 = vpop.f32.mrf.mxu2 }
 0x27c   : > { %v880_v38 = vadd.f32 %v879_v50, %v868_v48  ;;  %v858_v51 = vpop.f32.mrf.mxu1 }
 0x27e   : > { %v2350_v52 = vmul.f32 -1.442695, %v880_v38 }
 0x280   : > { %2641 = vpow2.f32 %v2350_v52 }
 0x283   : > { %v881_v53 = vpop.f32.mrf.mxu2 }
 0x286   : > { %v2642_v54 = vpop.eup %2641 }
 0x287   : > { %v886_v55 = vadd.f32 1.0, %v2642_v54 }
 0x289   : > { %2643 = vrcp.f32 %v886_v55  ;;  %v898_v59 = vand.u32 2147483648, %v886_v55  ;;  %v896_v61 = vand.u32 2147483647, %v886_v55  ;;  %vm892_vm3 = vweird.f32 %v886_v55 }
 0x28b   : > { %v899_v63 = vor.u32 1.1754944e-38, %v898_v59  ;;  %vm897_vm5 = vcmp.eq.f32.partialorder %v896_v61, 8.507059e+37 }
 0x28f   : > { %v2644_v56 = vpop.eup %2643 }
 0x290   : > { %v888_v57 = vmul.f32 %v2644_v56, %v886_v55  ;;  %vm893_vm2 = vweird.f32 %v2644_v56 }
 0x291   : > { %vm894_vm4 = vmor %vm892_vm3, %vm893_vm2 }
 0x292   : > { %v889_v58 = vsub.f32 1.0, %v888_v57 }
 0x294   : > { %v890_v60 = vmul.f32 %v2644_v56, %v889_v58 }
 0x296   : > { %v891_v62 = vadd.f32 %v2644_v56, %v890_v60 }
 0x298   : > { %v895_v1 = vsel %vm894_vm4, %v2644_v56, %v891_v62 }
 0x299   : > { %v900_v2 = vsel %vm897_vm5, %v899_v63, %v895_v1 }
 0x29a   : > { %v902_v3 = vmul.f32 %v900_v2, %v880_v38 }
 0x29c   : > { %v903_v4 = vpack.c.bf16 %v902_v3, %v902_v3 }
 0x29e   : > { %2359 = vmatmul.msk.bf16.vlgmr.msrb.gmra.mxu3 %vm580_vm0, %v903_v4 }
 0x321   : > { %v928_v5 = vpop.f32.mrf.mxu3 }
 0x322   : > { %v932_v6 = vadd.f32 %v928_v5, %v860_v46 }
 0x324   : > { %v933_v8 = vadd.f32 %v932_v6, %v3107_v0 }
 0x326   : > { %v936_v9 = vadd.f32 %v2607_v7, %v933_v8 }
 0x328   : > { %v3190_v10 = vadd.f32 %v936_v9, %v3107_v0  ;;  %v2471_v0 = vld [vmem:[%s3571_s7] sm:$0xff] }
 0x329   : > { %v930_v12 = vpop.f32.mrf.mxu3  ;;  %993 = vmatpush.bf16.msra.mxu0 %v2471_v0 }
 0x32a   : > { %v938_v13 = vsel %vm580_vm0, %v3190_v10, 0.0 }
 0x32b   : > { %939 = vadd.xlane.f32.xlu1 %v938_v13 }
 0x39e   : > { %v940_v14 = vpop.xlane.xlu1 %939 }
 0x39f   : > { %v941_v15 = vmul.f32 %v940_v14, %v3129_v11 }
 0x3a1   : > { %v942_v16 = vsub.f32 %v3190_v10, %v941_v15 }
 0x3a3   : > { %v943_v17 = vmul.f32 %v942_v16, %v942_v16 }
 0x3a5   : > { %v944_v18 = vsel %vm580_vm0, %v943_v17, 0.0 }
 0x3a6   : > { %945 = vadd.xlane.f32.xlu2 %v944_v18 }
 0x3be   : > { %1027 = vrot.lane.b32.xlu2 %v3203_v20, %s2899_s19 }
 0x419   : > { %v946_v21 = vpop.xlane.xlu2 %945 }
 0x41a   : > { %v947_v22 = vmul.f32 %v946_v21, %v3129_v11 }
 0x41c   : > { %v948_v23 = vadd.f32 1e-05, %v947_v22 }
 0x41e   : > { %2645 = vrsqrt.f32 %v948_v23  ;;  %vm955_vm7 = vweird.f32 %v948_v23 }
 0x421   : > { %v1028_v42 = vpop.permute.xlu2 %1027 }
 0x424   : > { %v2646_v24 = vpop.eup %2645 }
 0x425   : > { %v950_v25 = vmul.f32 %v2646_v24, %v948_v23  ;;  %vm956_vm6 = vweird.f32 %v2646_v24 }
 0x426   : > { %vm957_vm8 = vmor %vm955_vm7, %vm956_vm6 }
 0x427   : > { %v951_v26 = vmul.f32 %v2646_v24, %v950_v25 }
 0x429   : > { %v952_v27 = vmul.f32 0.5, %v951_v26 }
 0x42b   : > { %v953_v28 = vsub.f32 1.5, %v952_v27 }
 0x42d   : > { %v954_v29 = vmul.f32 %v2646_v24, %v953_v28 }
 0x42f   : > { %v958_v31 = vsel %vm957_vm8, %v2646_v24, %v954_v29 }
 0x430   : > { %v959_v32 = vmul.f32 %v958_v31, %v942_v16 }
 0x432   : > { %v962_v34 = vmul.f32 %v2608_v30, %v959_v32 }
 0x434   : > { %v965_v35 = vadd.f32 %v2609_v33, %v962_v34 }
 0x436   : > { %v966_v36 = vpack.c.bf16 %v965_v35, %v965_v35 }
 0x438   : > { %2368 = vmatmul.msk.bf16.vlgmr.msra.gmra.mxu0 %vm580_vm0, %v966_v36 }
 0x4b5   : > { %v995_v37 = vpop.f32.mrf.mxu0 }
 0x4b6   : > { %v999_v39 = vpack.c.bf16 %v995_v37, %v995_v37 }
 0x4b8   : > { %v3215_v40 = vunpack.c.l.bf16 %v999_v39  ;;  %v1083_v60 = vunpack.c.l.b16 %v999_v39 }
 0x4ba   : > { %1147 = vrot.lane.b32.xlu2 %v3215_v40, %s2901_s24  ;;  %1032 = vrot.lane.b32.xlu0 %v3215_v40, %s2898_s28  ;;  %v1030_v53 = vmul.f32 %v1028_v42, %v3215_v40  ;;  %v3253_v61 = vpack.c.b16 %v1083_v60, %v1083_v60  ;;  %v1007_v4 = vmul.f32 %v3215_v40, %v3203_v20 }
 0x4bd   : > { %v997_v41 = vpop.f32.mrf.mxu0 }
 0x4c2   : > { %1298 = vrot.lane.b32.xlu2 %v3215_v40, %s2902_s27 }
 0x4ca   : > { %1278 = vrot.lane.b32.xlu2 %v3215_v40, %s2903_s0 }
 0x514   : > { %v3225_v43 = vpop.permute.xlu2 %1147 }
 0x515   : > { %1150 = vrot.lane.b32.xlu2 %v3225_v43, %s2904_s17 }
 0x51c   : > { %v3258_v63 = vpop.permute.xlu2 %1298 }
 0x524   : > { %v3262_v1 = vpop.permute.xlu2 %1278 }
 0x52c   : > { %v1033_v44 = vpop.permute.xlu0 %1032 }
 0x52d   : > { %1035 = vrot.lane.b32.xlu0 %v1033_v44, %s2904_s17 }
 0x535   : > { %1016 = vrot.lane.b32.xlu0 %v1001_v45, %s2905_s18 }
 0x56f   : > { %v1151_v12 = vpop.permute.xlu2 %1150 }
 0x570   : > { %v1152_v14 = vsel %vm1008_vm9, %v1151_v12, %v3225_v43 }
 0x59f   : > { %v1036_v46 = vpop.permute.xlu0 %1035 }
 0x5a0   : > { %v1037_v47 = vsel %vm1008_vm9, %v1036_v46, %v1033_v44 }
 0x5a1   : > { %1038 = vrot.lane.b32.xlu0 %v1037_v47, %s2904_s17 }
 0x5a7   : > { %v3235_v48 = vpop.permute.xlu0 %1016 }
 0x5a9   : > { %1009 = vrot.lane.b32.xlu0 %v3215_v40, %s2904_s17 }
 0x613   : > { %v1039_v49 = vpop.permute.xlu0 %1038 }
 0x614   : > { %v1040_v50 = vsel %vm1008_vm9, %v1039_v49, %v1033_v44 }
 0x615   : > { %v1041_v38 = vmul.f32 %v1040_v50, %v3235_v48 }
 0x617   : > { %1043 = vrot.lane.b32.xlu1 %v1041_v38, %s2906_s26  ;;  %s2914_s26 = smov 52  }
 0x61b   : > { %v1010_v51 = vpop.permute.xlu0 %1009 }
 0x61c   : > { %v1011_v52 = vsel %vm1008_vm9, %v1010_v51, %v3215_v40 }
 0x61d   : > { %1012 = vrot.lane.b32.xlu0 %v1011_v52, %s2904_s17 }
 0x61f   : > { %1127 = vrot.lane.b32.xlu1 %v3215_v40, %s2907_s29 }
 0x689   : > { %v1044_v54 = vpop.permute.xlu1 %1043 }
 0x68a   : > { %v1046_v55 = vadd.f32 %v1044_v54, %v1030_v53 }
 0x68c   : > { %v1047_v56 = vpack.c.bf16 %v1046_v55, %v1046_v55 }
 0x68e   : > { %1049 = vrot.lane.b32.xlu0 %v1047_v56, %s2898_s28 }
 0x68f   : > { %v1013_v57 = vpop.permute.xlu0 %1012 }
 0x690   : > { %v1014_v58 = vsel %vm1008_vm9, %v1013_v57, %v3215_v40 }
 0x691   : > { %v1019_v59 = vmul.f32 %v3235_v48, %v1014_v58  ;;  %v1128_v62 = vpop.permute.xlu1 %1127 }
 0x696   : > { %1021 = vrot.lane.b32.xlu0 %v1019_v59, %s2908_s23  ;;  %s2915_s23 = smov 24  }
 0x69e   : > { %1431 = vrot.lane.b32.xlu0 %v3215_v40, %s2909_s30 }
 0x6a6   : > { %1411 = vrot.lane.b32.xlu0 %v3215_v40, %s2910_s21 }
 0x6ae   : > { %1085 = vrot.lane.b32.xlu0 %v3253_v61, %s2900_s20 }
 0x6b6   : > { %1130 = vrot.lane.b32.xlu0 %v1128_v62, %s2904_s17 }
 0x6be   : > { %1301 = vrot.lane.b32.xlu0 %v3258_v63, %s2904_s17 }
 0x6c6   : > { %1281 = vrot.lane.b32.xlu0 %v3262_v1, %s2904_s17 }
 0x700   : > { %v1050_v2 = vpop.permute.xlu0 %1049 }
 0x701   : > { %v1056_v3 = vsel %vm1051_vm10, %v1050_v2, 0 }
 0x702   : > { %1065 = vmatpush.bf16.xpose.msra.mxu1 %v1056_v3 }
 0x708   : > { %v1022_v5 = vpop.permute.xlu0 %1021 }
 0x709   : > { %v1024_v6 = vadd.f32 %v1022_v5, %v1007_v4 }
 0x70b   : > { %v1025_v7 = vpack.c.bf16 %v1024_v6, %v1024_v6 }
 0x70d   : > { %2369 = vmatmul.msk.bf16.vlgmr.msra.gmra.mxu1 %vm1051_vm10, %v1025_v7 }
 0x710   : > { %v1432_v8 = vpop.permute.xlu0 %1431 }
 0x711   : > { %1434 = vrot.lane.b32.xlu2 %v1432_v8, %s2904_s17 }
 0x718   : > { %v3271_v9 = vpop.permute.xlu0 %1411 }
 0x719   : > { %1414 = vrot.lane.b32.xlu2 %v3271_v9, %s2904_s17 }
 0x720   : > { %v1086_v13 = vpop.permute.xlu0 %1085 }
 0x721   : > { %v1092_v15 = vsel %vm1090_vm11, %v1086_v13, 0  ;;  %1153 = vrot.lane.b32.xlu2 %v1152_v14, %s2904_s17 }
 0x722   : > { %1101 = vmatpush.bf16.msra.mxu2 %v1092_v15 }
 0x728   : > { %v1131_v16 = vpop.permute.xlu0 %1130 }
 0x729   : > { %v1132_v21 = vsel %vm1008_vm9, %v1131_v16, %v1128_v62 }
 0x730   : > { %v1302_v17 = vpop.permute.xlu0 %1301 }
 0x731   : > { %v1303_v33 = vsel %vm1008_vm9, %v1302_v17, %v3258_v63 }
 0x738   : > { %v1282_v18 = vpop.permute.xlu0 %1281 }
 0x739   : > { %v1283_v19 = vsel %vm1008_vm9, %v1282_v18, %v3262_v1 }
 0x73a   : > { %1284 = vrot.lane.b32.xlu2 %v1283_v19, %s2904_s17 }
 0x76b   : > { %v1435_v0 = vpop.permute.xlu2 %1434 }
 0x76c   : > { %v1436_v22 = vsel %vm1008_vm9, %v1435_v0, %v1432_v8 }
 0x76d   : > { %v2594_v23 = vpack.i.bf16 %v1436_v22, %v1132_v21 }
 0x76f   : > { %2595 = vrot.lane.b32.xlu0 %v2594_v23, %s2904_s17 }
 0x773   : > { %v1415_v24 = vpop.permute.xlu2 %1414 }
 0x774   : > { %v1416_v32 = vsel %vm1008_vm9, %v1415_v24, %v3271_v9 }
 0x775   : > { %v2599_v34 = vpack.i.bf16 %v1416_v32, %v1303_v33  ;;  %v1002_v32 = vld [vmem:[%s3572_s8] sm:$0xf] }
 0x776   : > { %v1259_v33 = vsel %vm1090_vm11, %v1002_v32, 0 }
 0x777   : > { %1143 = vrot.lane.b32.xlu0 %v3203_v20, %s2911_s5  ;;  %1268 = vmatpush.bf16.msrb.mxu2 %v1259_v33 }
 0x77b   : > { %v1154_v25 = vpop.permute.xlu2 %1153 }
 0x77c   : > { %v1155_v26 = vsel %vm1008_vm9, %v1154_v25, %v3225_v43 }
 0x77d   : > { %v1156_v27 = vmul.f32 %v1155_v26, %v3235_v48 }
 0x77f   : > { %1123 = vrot.lane.b32.xlu0 %v3203_v20, %s2904_s17  ;;  %1158 = vrot.lane.b32.xlu2 %v1156_v27, %s2912_s9  ;;  %s2917_s9 = smov 12  }
 0x787   : > { %1427 = vrot.lane.b32.xlu0 %v3203_v20, %s2913_s10 }
 0x78a   : > { %v1067_v28 = vpop.f32.mrf.mxu1 }
 0x78b   : > { %v1071_v29 = vmul.f32 0.35355338, %v1067_v28 }
 0x78d   : > { %v1072_v30 = vsel %vm1051_vm10, %v1071_v29, -inf }
 0x78e   : > { %1073 = vmax.xlane.f32.xlu1 %v1072_v30 }
 0x792   : > { %v1069_v31 = vpop.f32.mrf.mxu1 }
 0x794   : > { %v1285_v44 = vpop.permute.xlu2 %1284 }
 0x795   : > { %v1286_v45 = vsel %vm1008_vm9, %v1285_v44, %v3262_v1 }
 0x796   : > { %v1287_v46 = vmul.f32 %v1286_v45, %v3235_v48 }
 0x7a7   : > { %2600 = vrot.lane.b32.xlu1 %v2599_v34, %s2904_s17  ;;  %s2916_s17 = smov 48  }
 0x7e1   : > { %v2596_v35 = vpop.permute.xlu0 %2595 }
 0x7e2   : > { %v2598_v36 = vunpack.i.h.bf16 %v2596_v35  ;;  %v2597_v37 = vunpack.i.l.bf16 %v2596_v35 }
 0x7e4   : > { %v1439_v39 = vsel %vm1008_vm9, %v2598_v36, %v1432_v8  ;;  %v1135_v41 = vsel %vm1008_vm9, %v2597_v37, %v1128_v62  ;;  %v1159_v62 = vpop.permute.xlu2 %1158 }
 0x7e5   : > { %v1440_v42 = vmul.f32 %v1439_v39, %v3235_v48  ;;  %v1136_v43 = vmul.f32 %v1135_v41, %v3235_v48 }
 0x7e7   : > { %1442 = vrot.lane.b32.xlu1 %v1440_v42, %s2914_s26  ;;  %1138 = vrot.lane.b32.xlu2 %v1136_v43, %s2905_s18  ;;  %s2918_s18 = smov 44   ;;  %s2919_s26 = smov 20  }
 0x7e9   : > { %v1144_v59 = vpop.permute.xlu0 %1143 }
 0x7ea   : > { %v1146_v60 = vmul.f32 %v1144_v59, %v3215_v40 }
 0x7ec   : > { %v1161_v1 = vadd.f32 %v1159_v62, %v1146_v60 }
 0x7ef   : > { %1407 = vrot.lane.b32.xlu1 %v3203_v20, %s2915_s23  ;;  %1294 = vrot.lane.b32.xlu2 %v3203_v20, %s2916_s17  ;;  %s2920_s23 = smov 16  }
 0x7f1   : > { %v1124_v2 = vpop.permute.xlu0 %1123 }
 0x7f2   : > { %v1126_v3 = vmul.f32 %v1124_v2, %v3215_v40 }
 0x7f7   : > { %1289 = vrot.lane.b32.xlu1 %v1287_v46, %s2917_s9 }
 0x7f9   : > { %v1428_v7 = vpop.permute.xlu0 %1427 }
 0x7fa   : > { %v1430_v8 = vmul.f32 %v1428_v7, %v3215_v40 }
 0x801   : > { %v1074_v47 = vpop.xlane.xlu1 %1073 }
 0x802   : > { %v1075_v49 = vsub.f32 %v1071_v29, %v1074_v47 }
 0x804   : > { %v1076_v50 = vmul.f32 1.442695, %v1075_v49 }
 0x806   : > { %2647 = vpow2.f32 %v1076_v50 }
 0x80c   : > { %v2648_v38 = vpop.eup %2647 }
 0x80d   : > { %v1081_v51 = vpack.c.bf16 %v2648_v38, %v2648_v38  ;;  %v1078_v6 = vsel %vm1051_vm10, %v2648_v38, 0.0 }
 0x80f   : > { %2370 = vmatmul.msk.bf16.vlgmr.msra.gmra.mxu2 %vm1051_vm10, %v1081_v51 }
 0x819   : > { %v2601_v52 = vpop.permute.xlu1 %2600 }
 0x81a   : > { %v2603_v53 = vunpack.i.h.bf16 %v2601_v52  ;;  %v2602_v54 = vunpack.i.l.bf16 %v2601_v52 }
 0x81c   : > { %v1306_v55 = vsel %vm1008_vm9, %v2602_v54, %v3258_v63  ;;  %v1419_v56 = vsel %vm1008_vm9, %v2603_v53, %v3271_v9  ;;  %v1162_v63 = vpack.c.bf16 %v1161_v1, %v1161_v1 }
 0x81d   : > { %v1307_v57 = vmul.f32 %v1306_v55, %v3235_v48  ;;  %v1420_v58 = vmul.f32 %v1419_v56, %v3235_v48 }
 0x81f   : > { %1309 = vrot.lane.b32.xlu0 %v1307_v57, %s2918_s18  ;;  %1422 = vrot.lane.b32.xlu2 %v1420_v58, %s2919_s26 }
 0x827   : > { %1274 = vrot.lane.b32.xlu0 %v3203_v20, %s2920_s23 }
 0x82f   : > { %1167 = vrot.lane.b32.xlu0 %v1162_v63, %s2901_s24 }
 0x841   : > { %v1139_v4 = vpop.permute.xlu2 %1138 }
 0x842   : > { %v1141_v48 = vadd.f32 %v1139_v4, %v1126_v3 }
 0x844   : > { %v1142_v5 = vpack.c.bf16 %v1141_v48, %v1141_v48 }
 0x846   : > { %1164 = vrot.lane.b32.xlu1 %v1142_v5, %s2907_s29 }
 0x848   : > { %1079 = vadd.xlane.f32.xlu2 %v1078_v6 }
 0x849   : > { %v1295_v13 = vpop.permute.xlu2 %1294 }
 0x84a   : > { %v1297_v19 = vmul.f32 %v1295_v13, %v3215_v40 }
 0x859   : > { %v1443_v20 = vpop.permute.xlu1 %1442 }
 0x85a   : > { %v1445_v9 = vadd.f32 %v1443_v20, %v1430_v8 }
 0x85c   : > { %v1446_v12 = vpack.c.bf16 %v1445_v9, %v1445_v9 }
 0x85e   : > { %1451 = vrot.lane.b32.xlu0 %v1446_v12, %s2909_s30 }
 0x861   : > { %v1408_v14 = vpop.permute.xlu1 %1407 }
 0x862   : > { %v1410_v15 = vmul.f32 %v1408_v14, %v3215_v40 }
 0x869   : > { %v1290_v27 = vpop.permute.xlu1 %1289 }
 0x879   : > { %v1423_v16 = vpop.permute.xlu2 %1422 }
 0x87a   : > { %v1425_v17 = vadd.f32 %v1423_v16, %v1410_v15 }
 0x87c   : > { %v1426_v18 = vpack.c.bf16 %v1425_v17, %v1425_v17 }
 0x87e   : > { %1448 = vrot.lane.b32.xlu0 %v1426_v18, %s2910_s21 }
 0x891   : > { %v1310_v0 = vpop.permute.xlu0 %1309 }
 0x892   : > { %v1312_v21 = vadd.f32 %v1310_v0, %v1297_v19  ;;  %v1103_v22 = vpop.f32.mrf.mxu2 }
 0x894   : > { %v1313_v23 = vpack.c.bf16 %v1312_v21, %v1312_v21 }
 0x896   : > { %1318 = vrot.lane.b32.xlu1 %v1313_v23, %s2902_s27 }
 0x899   : > { %v1275_v24 = vpop.permute.xlu0 %1274 }
 0x89a   : > { %v1277_v25 = vmul.f32 %v1275_v24, %v3215_v40  ;;  %v1105_v26 = vpop.f32.mrf.mxu2 }
 0x89c   : > { %v1292_v28 = vadd.f32 %v1290_v27, %v1277_v25 }
 0x89e   : > { %v1293_v29 = vpack.c.bf16 %v1292_v28, %v1292_v28 }
 0x8a0   : > { %1315 = vrot.lane.b32.xlu1 %v1293_v29, %s2903_s0 }
 0x8a1   : > { %v1168_v30 = vpop.permute.xlu0 %1167 }
 0x8a2   : > { %v1173_v31 = vsel %vm1051_vm10, %v1168_v30, 0 }
 0x8a3   : > { %1182 = vmatpush.bf16.xpose.msra.mxu3 %v1173_v31  ;;  %v1003_v31 = vld [vmem:[%s3572_s8 + $0x4] sm:$0xf] }
 0x8a4   : > { %v1240_v32 = vsel %vm1090_vm11, %v1003_v31, 0 }
 0x8a5   : > { %1249 = vmatpush.bf16.msrb.mxu1 %v1240_v32 }
 0x8a8   : > { %1199 = vrot.lane.b32.xlu1 %v3253_v61, %s2913_s10 }
 0x8b8   : > { %v1165_v40 = vpop.permute.xlu1 %1164 }
 0x8b9   : > { %2371 = vmatmul.msk.bf16.vlgmr.msra.gmra.mxu3 %vm1051_vm10, %v1165_v40 }
 0x8bb   : > { %v1080_v34 = vpop.xlane.xlu2 %1079 }
 0x8bc   : > { %2649 = vrcp.f32 %v1080_v34  ;;  %v1118_v39 = vand.u32 2147483648, %v1080_v34  ;;  %v1116_v42 = vand.u32 2147483647, %v1080_v34  ;;  %vm1112_vm13 = vweird.f32 %v1080_v34 }
 0x8be   : > { %v1119_v44 = vor.u32 1.1754944e-38, %v1118_v39  ;;  %vm1117_vm15 = vcmp.eq.f32.partialorder %v1116_v42, 8.507059e+37 }
 0x8c2   : > { %v2650_v35 = vpop.eup %2649 }
 0x8c3   : > { %v1108_v36 = vmul.f32 %v2650_v35, %v1080_v34  ;;  %vm1113_vm12 = vweird.f32 %v2650_v35 }
 0x8c4   : > { %vm1114_vm14 = vmor %vm1112_vm13, %vm1113_vm12 }
 0x8c5   : > { %v1109_v37 = vsub.f32 1.0, %v1108_v36 }
 0x8c7   : > { %v1110_v41 = vmul.f32 %v2650_v35, %v1109_v37 }
 0x8c9   : > { %v1111_v43 = vadd.f32 %v2650_v35, %v1110_v41 }
 0x8cb   : > { %v1115_v45 = vsel %vm1114_vm14, %v2650_v35, %v1111_v43 }
 0x8cc   : > { %v1120_v46 = vsel %vm1117_vm15, %v1119_v44, %v1115_v45 }
 0x8cd   : > { %v1121_v47 = vmul.f32 %v1120_v46, %v1103_v22 }
 0x8cf   : > { %v1122_v49 = vpack.c.bf16 %v1121_v47, %v1121_v47 }
 0x8d0   : > { %v1452_v50 = vpop.permute.xlu0 %1451 }
 0x8d1   : > { %v1457_v38 = vsel %vm1051_vm10, %v1452_v50, 0  ;;  %2374 = vmatmul.msk.bf16.vlgmr.msrb.gmra.mxu2 %vm1051_vm10, %v1122_v49  ;;  %v1004_v49 = vld [vmem:[%s3572_s8 + $0x8] sm:$0xf] }
 0x8d2   : > { %1466 = vmatpush.bf16.xpose.msra.mxu2 %v1457_v38  ;;  %v1391_v50 = vsel %vm1090_vm11, %v1004_v49, 0  ;;  %v1005_v38 = vld [vmem:[%s3572_s8 + $0xc] sm:$0xf] }
 0x8d3   : > { %1400 = vmatpush.bf16.msra.mxu1 %v1391_v50 }
 0x8f0   : > { %v1449_v51 = vpop.permute.xlu0 %1448 }
 0x8f1   : > { %2378 = vmatmul.msk.bf16.vlgmr.msra.gmra.mxu2 %vm1051_vm10, %v1449_v51  ;;  %v1524_v51 = vsel %vm1090_vm11, %v1005_v38, 0  ;;  %v2611_v38 = vld [vmem:[%s3579_s15 + $0x6] ss:$0 sm:$0xff] }
 0x908   : > { %v1319_v52 = vpop.permute.xlu1 %1318 }
 0x909   : > { %v1324_v53 = vsel %vm1051_vm10, %v1319_v52, 0 }
 0x90a   : > { %1333 = vmatpush.bf16.xpose.msrb.mxu3 %v1324_v53 }
 0x912   : > { %v1316_v54 = vpop.permute.xlu1 %1315 }
 0x913   : > { %2375 = vmatmul.msk.bf16.vlgmr.msrb.gmra.mxu3 %vm1051_vm10, %v1316_v54 }
 0x91a   : > { %v1200_v55 = vpop.permute.xlu1 %1199 }
 0x91b   : > { %v1205_v56 = vsel %vm1090_vm11, %v1200_v55, 0 }
 0x91c   : > { %1214 = vmatpush.bf16.msrb.mxu0 %v1205_v56 }
 0x93c   : > { %v1184_v57 = vpop.f32.mrf.mxu3 }
 0x93d   : > { %v1188_v58 = vmul.f32 0.35355338, %v1184_v57 }
 0x93f   : > { %v1189_v59 = vsel %vm1051_vm10, %v1188_v58, -inf }
 0x940   : > { %1190 = vmax.xlane.f32.xlu0 %v1189_v59 }
 0x944   : > { %v1186_v60 = vpop.f32.mrf.mxu3 }
 0x954   : > { %v3347_v62 = vpop.f32.mrf.mxu2  ;;  %1350 = vrot.lane.b32.xlu0 %v3253_v61, %s2916_s17  ;;  %s2458_s17 = sshll.u32 %s3028_s25, 3 }
 0x955   : > { %s2189_s24 = scalar_lea.hbm %s3580_s16, %s2458_s17 }
 0x95c   : > { %v1272_v1 = vpop.f32.mrf.mxu2 }
 0x974   : > { %v1468_v63 = vpop.f32.mrf.mxu2 }
 0x975   : > { %v1472_v2 = vmul.f32 0.35355338, %v1468_v63 }
 0x977   : > { %v1473_v3 = vsel %vm1051_vm10, %v1472_v2, -inf }
 0x978   : > { %1474 = vmax.xlane.f32.xlu1 %v1473_v3 }
 0x97c   : > { %v1470_v4 = vpop.f32.mrf.mxu2 }
 0x996   : > { %v1335_v48 = vpop.f32.mrf.mxu3 }
 0x997   : > { %v1339_v5 = vmul.f32 0.35355338, %v1335_v48 }
 0x999   : > { %v1340_v6 = vsel %vm1051_vm10, %v1339_v5, -inf }
 0x99a   : > { %1341 = vmax.xlane.f32.xlu2 %v1340_v6 }
 0x99e   : > { %v1337_v7 = vpop.f32.mrf.mxu3 }
 0x9b2   : > { %1483 = vrot.lane.b32.xlu2 %v3253_v61, %s2911_s5  ;;  %s571_s5 = sand.u32 1, %s2881_s22  }
 0x9b3   : > { %v1191_v8 = vpop.xlane.xlu0 %1190  ;;  %s2306_s10 = sshll.u32 %s571_s5, 3  ;;  %s2179_s0 = scalar_lea.sflag [#allocation4], %s571_s5 }
 0x9b4   : > { %v1192_v20 = vsub.f32 %v1188_v58, %v1191_v8 }
 0x9b6   : > { %v1193_v9 = vmul.f32 1.442695, %v1192_v20 }
 0x9b8   : > { %2651 = vpow2.f32 %v1193_v9 }
 0x9be   : > { %v2652_v12 = vpop.eup %2651 }
 0x9bf   : > { %v1198_v13 = vpack.c.bf16 %v2652_v12, %v2652_v12  ;;  %v1195_v16 = vsel %vm1051_vm10, %v2652_v12, 0.0 }
 0x9c1   : > { %2372 = vmatmul.msk.bf16.vlgmr.msrb.gmra.mxu0 %vm1051_vm10, %v1198_v13 }
 0x9c6   : > { %v1351_v14 = vpop.permute.xlu0 %1350 }
 0x9c7   : > { %v1356_v15 = vsel %vm1090_vm11, %v1351_v14, 0 }
 0x9c8   : > { %1365 = vmatpush.bf16.msra.mxu0 %v1356_v15 }
 0x9cc   : > { %1533 = vmatpush.bf16.msrb.mxu0 %v1524_v51 }
 0x9db   : > { %1196 = vadd.xlane.f32.xlu2 %v1195_v16 }
 0x9eb   : > { %v1475_v17 = vpop.xlane.xlu1 %1474 }
 0x9ec   : > { %v1476_v18 = vsub.f32 %v1472_v2, %v1475_v17 }
 0x9ee   : > { %v1477_v19 = vmul.f32 1.442695, %v1476_v18 }
 0x9f0   : > { %2653 = vpow2.f32 %v1477_v19 }
 0x9f6   : > { %v2654_v22 = vpop.eup %2653 }
 0x9f7   : > { %v1482_v26 = vpack.c.bf16 %v2654_v22, %v2654_v22  ;;  %v1479_v29 = vsel %vm1051_vm10, %v2654_v22, 0.0 }
 0xa0d   : > { %v1342_v0 = vpop.xlane.xlu2 %1341 }
 0xa0e   : > { %v1343_v61 = vsub.f32 %v1339_v5, %v1342_v0 }
 0xa10   : > { %v1344_v21 = vmul.f32 1.442695, %v1343_v61 }
 0xa12   : > { %2655 = vpow2.f32 %v1344_v21 }
 0xa15   : > { %v1484_v23 = vpop.permute.xlu2 %1483 }
 0xa16   : > { %v1489_v24 = vsel %vm1090_vm11, %v1484_v23, 0 }
 0xa17   : > { %1498 = vmatpush.bf16.msra.mxu3 %v1489_v24 }
 0xa18   : > { %v2656_v25 = vpop.eup %2655 }
 0xa19   : > { %v1349_v27 = vpack.c.bf16 %v2656_v25, %v2656_v25  ;;  %v1346_v28 = vsel %vm1051_vm10, %v2656_v25, 0.0 }
 0xa1a   : > { %1347 = vadd.xlane.f32.xlu1 %v1346_v28  ;;  %2379 = vmatmul.msk.bf16.vlgmr.msra.gmra.mxu3 %vm1051_vm10, %v1482_v26 }
 0xa1b   : > { %2376 = vmatmul.msk.bf16.vlgmr.msra.gmra.mxu0 %vm1051_vm10, %v1349_v27 }
 0xa22   : > { %1480 = vadd.xlane.f32.xlu1 %v1479_v29 }
 0xa3e   : > { %v1216_v30 = vpop.f32.mrf.mxu0 }
 0xa46   : > { %v1218_v33 = vpop.f32.mrf.mxu0 }
 0xa4e   : > { %v1197_v40 = vpop.xlane.xlu2 %1196 }
 0xa4f   : > { %2657 = vrcp.f32 %v1197_v40  ;;  %v1231_v37 = vand.u32 2147483648, %v1197_v40  ;;  %v1229_v41 = vand.u32 2147483647, %v1197_v40  ;;  %vm1225_vm2 = vweird.f32 %v1197_v40 }
 0xa51   : > { %v1232_v43 = vor.u32 1.1754944e-38, %v1231_v37  ;;  %vm1230_vm4 = vcmp.eq.f32.partialorder %v1229_v41, 8.507059e+37 }
 0xa55   : > { %v2658_v34 = vpop.eup %2657 }
 0xa56   : > { %v1221_v35 = vmul.f32 %v2658_v34, %v1197_v40  ;;  %vm1226_vm1 = vweird.f32 %v2658_v34 }
 0xa57   : > { %vm1227_vm3 = vmor %vm1225_vm2, %vm1226_vm1 }
 0xa58   : > { %v1222_v36 = vsub.f32 1.0, %v1221_v35  ;;  %v2474_v35 = vld [vmem:[%s3575_s11 + $0x8] sm:$0xff] }
 0xa5a   : > { %v1223_v39 = vmul.f32 %v2658_v34, %v1222_v36 }
 0xa5c   : > { %v1224_v42 = vadd.f32 %v2658_v34, %v1223_v39 }
 0xa5e   : > { %v1228_v44 = vsel %vm1227_vm3, %v2658_v34, %v1224_v42 }
 0xa5f   : > { %v1233_v45 = vsel %vm1230_vm4, %v1232_v43, %v1228_v44 }
 0xa60   : > { %v1234_v46 = vmul.f32 %v1233_v45, %v1216_v30 }
 0xa62   : > { %v1235_v47 = vpack.c.bf16 %v1234_v46, %v1234_v46 }
 0xa64   : > { %2373 = vmatmul.msk.bf16.vlgmr.msrb.gmra.mxu1 %vm1051_vm10, %v1235_v47  ;;  %v2610_v47 = vld [vmem:[%s3579_s15 + $0x5] ss:$0 sm:$0xff] }
 0xa65   : > { %1600 = vmatpush.bf16.msrb.mxu1 %v2474_v35 }
 0xa8d   : > { %v1348_v52 = vpop.xlane.xlu1 %1347 }
 0xa8e   : > { %2659 = vrcp.f32 %v1348_v52  ;;  %v1382_v58 = vand.u32 2147483648, %v1348_v52  ;;  %v1380_v60 = vand.u32 2147483647, %v1348_v52  ;;  %vm1376_vm6 = vweird.f32 %v1348_v52 }
 0xa90   : > { %v1383_v2 = vor.u32 1.1754944e-38, %v1382_v58  ;;  %vm1381_vm8 = vcmp.eq.f32.partialorder %v1380_v60, 8.507059e+37 }
 0xa94   : > { %v2660_v53 = vpop.eup %2659 }
 0xa95   : > { %v1372_v54 = vmul.f32 %v2660_v53, %v1348_v52  ;;  %v1481_v55 = vpop.xlane.xlu1 %1480  ;;  %vm1377_vm5 = vweird.f32 %v2660_v53 }
 0xa96   : > { %2661 = vrcp.f32 %v1481_v55  ;;  %vm1378_vm7 = vmor %vm1376_vm6, %vm1377_vm5  ;;  %v1515_v8 = vand.u32 2147483648, %v1481_v55  ;;  %v1513_v13 = vand.u32 2147483647, %v1481_v55  ;;  %vm1509_vm11 = vweird.f32 %v1481_v55 }
 0xa97   : > { %v1373_v56 = vsub.f32 1.0, %v1372_v54  ;;  %v2612_v54 = vld [vmem:[%s3576_s12] ss:$0 sm:$0xff] }
 0xa98   : > { %v1367_v57 = vpop.f32.mrf.mxu0  ;;  %v1516_v15 = vor.u32 1.1754944e-38, %v1515_v8  ;;  %vm1514_vm13 = vcmp.eq.f32.partialorder %v1513_v13, 8.507059e+37 }
 0xa99   : > { %v1374_v59 = vmul.f32 %v2660_v53, %v1373_v56 }
 0xa9b   : > { %v1375_v1 = vadd.f32 %v2660_v53, %v1374_v59 }
 0xa9c   : > { %v2662_v63 = vpop.eup %2661 }
 0xa9d   : > { %v1505_v3 = vmul.f32 %v2662_v63, %v1481_v55  ;;  %v1379_v4 = vsel %vm1378_vm7, %v2660_v53, %v1375_v1  ;;  %v1500_v48 = vpop.f32.mrf.mxu3  ;;  %vm1510_vm9 = vweird.f32 %v2662_v63 }
 0xa9e   : > { %v1384_v5 = vsel %vm1381_vm8, %v1383_v2, %v1379_v4  ;;  %vm1511_vm12 = vmor %vm1509_vm11, %vm1510_vm9 }
 0xa9f   : > { %v1506_v6 = vsub.f32 1.0, %v1505_v3  ;;  %v1385_v7 = vmul.f32 %v1384_v5, %v1367_v57 }
 0xaa0   : > { %v1369_v20 = vpop.f32.mrf.mxu0 }
 0xaa1   : > { %v1386_v9 = vpack.c.bf16 %v1385_v7, %v1385_v7  ;;  %v1507_v12 = vmul.f32 %v2662_v63, %v1506_v6  ;;  %v1631_v20 = vlaneseq }
 0xaa3   : > { %v1508_v14 = vadd.f32 %v2662_v63, %v1507_v12  ;;  %2377 = vmatmul.msk.bf16.vlgmr.msra.gmra.mxu1 %vm1051_vm10, %v1386_v9  ;;  %v1632_v9 = vshrl.u32 %v1631_v20, 7 }
 0xaa5   : > { %v1512_v16 = vsel %vm1511_vm12, %v2662_v63, %v1508_v14  ;;  %v1502_v17 = vpop.f32.mrf.mxu3  ;;  %vm1633_vm5 = vcmp.gt.s32.totalorder %v1632_v9, 0  ;;  %vm1636_vm6 = vcmp.lt.s32.totalorder %v1632_v9, 7  ;;  %v2921_v14 = vmov 0.0  }
 0xaa6   : > { %v1517_v18 = vsel %vm1514_vm13, %v1516_v15, %v1512_v16  ;;  %v2391_v15 = vsel %vm1633_vm5, 1.0, %v2921_v14  ;;  %v2392_v16 = vsel %vm1636_vm6, 1.0, %v2921_v14  ;;  %v2613_v17 = vld [vmem:[%s3579_s15 + $0x7] ss:$0 sm:$0xff] }
 0xaa7   : > { %v1518_v19 = vmul.f32 %v1517_v18, %v1500_v48  ;;  %v2614_v18 = vld [vmem:[%s3579_s15 + $0x8] ss:$0 sm:$0xff] }
 0xaa9   : > { %v1519_v0 = vpack.c.bf16 %v1518_v19, %v1518_v19 }
 0xaab   : > { %2380 = vmatmul.msk.bf16.vlgmr.msrb.gmra.mxu0 %vm1051_vm10, %v1519_v0 }
 0xae1   : > { %v1251_v61 = vpop.f32.mrf.mxu1 }
 0xae2   : > { %v1271_v23 = vadd.f32 %v3347_v62, %v1251_v61  ;;  %v2615_v61 = vld [vmem:[%s3579_s15 + $0x9] ss:$0 sm:$0xff] }
 0xae9   : > { %v1253_v21 = vpop.f32.mrf.mxu1 }
 0xb20   : > { %v1402_v22 = vpop.f32.mrf.mxu1 }
 0xb21   : > { %v1406_v24 = vadd.f32 %v1402_v22, %v1271_v23 }
 0xb28   : > { %v1404_v25 = vpop.f32.mrf.mxu1  ;;  %v1535_v26 = vpop.f32.mrf.mxu0 }
 0xb29   : > { %v1539_v27 = vadd.f32 %v1535_v26, %v1406_v24 }
 0xb2b   : > { %v1540_v28 = vadd.f32 %v1539_v27, %v3190_v10 }
 0xb2d   : > { %v3381_v29 = vadd.f32 %v1540_v28, %v3190_v10  ;;  %v2473_v10 = vld [vmem:[%s3575_s11] sm:$0xff] }
 0xb2e   : > { %1601 = vmatpush.bf16.msrb.mxu1 %v2473_v10 }
 0xb2f   : > { %v1542_v30 = vsel %vm580_vm0, %v3381_v29, 0.0 }
 0xb30   : > { %1543 = vadd.xlane.f32.xlu0 %v1542_v30  ;;  %v1537_v31 = vpop.f32.mrf.mxu0  ;;  %v1677_v30 = vld [vmem:[%s3577_s13 + $0x18] sm:$0xff] }
 0xb31   : > { %v1676_v31 = vld [vmem:[%s3577_s13 + $0x10] sm:$0xff]  ;;  %1700 = vmatpush.msrb.mxu3 %v1677_v30 }
 0xb33   : > { %1701 = vmatpush.msrb.mxu3 %v1676_v31 }
 0xba3   : > { %v1544_v32 = vpop.xlane.xlu0 %1543 }
 0xba4   : > { %v1545_v33 = vmul.f32 %v1544_v32, %v3129_v11  ;;  %v1675_v32 = vld [vmem:[%s3577_s13 + $0x8] sm:$0xff] }
 0xba5   : > { %1702 = vmatpush.msrb.mxu3 %v1675_v32 }
 0xba6   : > { %v1546_v40 = vsub.f32 %v3381_v29, %v1545_v33  ;;  %v1674_v33 = vld [vmem:[%s3577_s13] sm:$0xff] }
 0xba7   : > { %1703 = vmatpush.msrb.mxu3 %v1674_v33 }
 0xba8   : > { %v1547_v62 = vmul.f32 %v1546_v40, %v1546_v40 }
 0xba9   : > { %1734 = vmatpush.msra.mxu3 %v1677_v30  ;;  %v2478_v30 = vld [vmem:[%s3568_s4 + $0x8] sm:$0xff] }
 0xbaa   : > { %v1548_v34 = vsel %vm580_vm0, %v1547_v62, 0.0 }
 0xbab   : > { %1549 = vadd.xlane.f32.xlu1 %v1548_v34  ;;  %1735 = vmatpush.msra.mxu3 %v1676_v31  ;;  %v3450_v31 = vld [vmem:[#allocation2] ss:$0 sm:$0xff] }
 0xbac   : > { %1907 = vrot.lane.b32.xlu0 %v3450_v31, %s2898_s28 }
 0xbad   : > { %1736 = vmatpush.msra.mxu3 %v1675_v32 }
 0xbaf   : > { %1737 = vmatpush.msra.mxu3 %v1674_v33 }
 0xc1e   : > { %v1550_v36 = vpop.xlane.xlu1 %1549 }
 0xc1f   : > { %v1551_v37 = vmul.f32 %v1550_v36, %v3129_v11 }
 0xc21   : > { %v1552_v39 = vadd.f32 1e-05, %v1551_v37 }
 0xc23   : > { %2663 = vrsqrt.f32 %v1552_v39  ;;  %vm1559_vm14 = vweird.f32 %v1552_v39 }
 0xc29   : > { %v2664_v41 = vpop.eup %2663 }
 0xc2a   : > { %v1554_v42 = vmul.f32 %v2664_v41, %v1552_v39  ;;  %vm1560_vm10 = vweird.f32 %v2664_v41 }
 0xc2b   : > { %vm1561_vm15 = vmor %vm1559_vm14, %vm1560_vm10 }
 0xc2c   : > { %v1555_v43 = vmul.f32 %v2664_v41, %v1554_v42 }
 0xc2e   : > { %v1556_v44 = vmul.f32 0.5, %v1555_v43 }
 0xc30   : > { %v1557_v45 = vsub.f32 1.5, %v1556_v44 }
 0xc32   : > { %v1558_v46 = vmul.f32 %v2664_v41, %v1557_v45 }
 0xc34   : > { %v1562_v49 = vsel %vm1561_vm15, %v2664_v41, %v1558_v46 }
 0xc35   : > { %v1563_v50 = vmul.f32 %v1562_v49, %v1546_v40 }
 0xc37   : > { %v1566_v51 = vmul.f32 %v2610_v47, %v1563_v50 }
 0xc39   : > { %v1569_v52 = vadd.f32 %v2611_v38, %v1566_v51 }
 0xc3b   : > { %v1570_v53 = vpack.c.bf16 %v1569_v52, %v1569_v52 }
 0xc3d   : > { %2389 = vmatmul.msk.bf16.vlgmr.msrb.gmra.mxu1 %vm580_vm0, %v1570_v53 }
 0xcba   : > { %v1603_v55 = vpop.f32.mrf.mxu1 }
 0xcbb   : > { %v1604_v56 = vadd.f32 %v2612_v54, %v1603_v55 }
 0xcbd   : > { %v2390_v57 = vmul.f32 -1.442695, %v1604_v56 }
 0xcbf   : > { %2665 = vpow2.f32 %v2390_v57 }
 0xcc2   : > { %v1605_v58 = vpop.f32.mrf.mxu1 }
 0xcc5   : > { %v2666_v59 = vpop.eup %2665 }
 0xcc6   : > { %v1610_v60 = vadd.f32 1.0, %v2666_v59 }
 0xcc8   : > { %2667 = vrcp.f32 %v1610_v60  ;;  %v1622_v3 = vand.u32 2147483648, %v1610_v60  ;;  %v1620_v48 = vand.u32 2147483647, %v1610_v60  ;;  %vm1616_vm2 = vweird.f32 %v1610_v60 }
 0xcca   : > { %v1623_v6 = vor.u32 1.1754944e-38, %v1622_v3  ;;  %vm1621_vm4 = vcmp.eq.f32.partialorder %v1620_v48, 8.507059e+37  ;;  %v2475_v48 = vld [vmem:[#allocation8] sm:$0xff] }
 0xcce   : > { %v2668_v1 = vpop.eup %2667 }
 0xccf   : > { %v1612_v63 = vmul.f32 %v2668_v1, %v1610_v60  ;;  %vm1617_vm1 = vweird.f32 %v2668_v1 }
 0xcd0   : > { %vm1618_vm3 = vmor %vm1616_vm2, %vm1617_vm1 }
 0xcd1   : > { %v1613_v2 = vsub.f32 1.0, %v1612_v63 }
 0xcd3   : > { %v1614_v4 = vmul.f32 %v2668_v1, %v1613_v2 }
 0xcd5   : > { %v1615_v5 = vadd.f32 %v2668_v1, %v1614_v4  ;;  %v2476_v4 = vld [vmem:[#allocation8 + $0x8] sm:$0xff] }
 0xcd6   : > { %1790 = vmatpush.bf16.msrb.mxu2 %v2476_v4 }
 0xcd7   : > { %v1619_v7 = vsel %vm1618_vm3, %v2668_v1, %v1615_v5 }
 0xcd8   : > { %v1624_v8 = vsel %vm1621_vm4, %v1623_v6, %v1619_v7 }
 0xcd9   : > { %1627 = vrot.lane.b32.xlu1 %v1624_v8, %s2898_s28 }
 0xcda   : > { %1791 = vmatpush.bf16.msrb.mxu2 %v2475_v48 }
 0xce1   : > { %1903 = vrot.lane.b32.xlu1 %v2478_v30, %s2898_s28 }
 0xce9   : > { %2002 = vrot.lane.b32.xlu1 %v2478_v30, %s2900_s20 }
 0xcf1   : > { %2074 = vrot.lane.b32.xlu1 %v2478_v30, %s2899_s19 }
 0xd4b   : > { %v1628_v12 = vpop.permute.xlu1 %1627 }
 0xd4c   : > { %v1630_v13 = vmul.f32 %v1628_v12, %v1604_v56 }
 0xd4e   : > { %v1639_v19 = vrot.slane %v1630_v13, 7  ;;  %v1641_v0 = vrot.slane %v1630_v13, 1  ;;  %v1648_v24 = vmul.f32 %v2614_v18, %v1630_v13 }
 0xd50   : > { %v1640_v21 = vmul.f32 %v2391_v15, %v1639_v19  ;;  %v1642_v22 = vmul.f32 %v2392_v16, %v1641_v0  ;;  %v2617_v19 = vld [vmem:[%s3579_s15 + $0xb] ss:$0 sm:$0xff] }
 0xd52   : > { %v1645_v23 = vmul.f32 %v2613_v17, %v1640_v21  ;;  %v1652_v26 = vmul.f32 %v2615_v61, %v1642_v22  ;;  %v2616_v17 = vld [vmem:[%s3579_s15 + $0xa] ss:$0 sm:$0xff]  ;;  %v2618_v22 = vld [vmem:[%s3579_s15 + $0xc] ss:$0 sm:$0xff] }
 0xd54   : > { %v1649_v25 = vadd.f32 %v1648_v24, %v1645_v23 }
 0xd56   : > { %v1653_v27 = vadd.f32 %v1652_v26, %v1649_v25 }
 0xd58   : > { %v2393_v28 = vmul.f32 -1.442695, %v1653_v27 }
 0xd5a   : > { %2669 = vpow2.f32 %v2393_v28 }
 0xd60   : > { %v2670_v40 = vpop.eup %2669 }
 0xd61   : > { %v1657_v62 = vadd.f32 1.0, %v2670_v40 }
 0xd63   : > { %2671 = vrcp.f32 %v1657_v62  ;;  %v1669_v36 = vand.u32 2147483648, %v1657_v62  ;;  %v1667_v39 = vand.u32 2147483647, %v1657_v62  ;;  %vm1663_vm8 = vweird.f32 %v1657_v62 }
 0xd65   : > { %v1670_v42 = vor.u32 1.1754944e-38, %v1669_v36  ;;  %vm1668_vm11 = vcmp.eq.f32.partialorder %v1667_v39, 8.507059e+37 }
 0xd69   : > { %v2672_v34 = vpop.eup %2671 }
 0xd6a   : > { %v1659_v35 = vmul.f32 %v2672_v34, %v1657_v62  ;;  %vm1664_vm7 = vweird.f32 %v2672_v34 }
 0xd6b   : > { %vm1665_vm9 = vmor %vm1663_vm8, %vm1664_vm7 }
 0xd6c   : > { %v1660_v10 = vsub.f32 1.0, %v1659_v35  ;;  %v1904_v35 = vpop.permute.xlu1 %1903 }
 0xd6d   : > { %1916 = vmatpush.bf16.msra.mxu0 %v1904_v35 }
 0xd6e   : > { %v1661_v37 = vmul.f32 %v2672_v34, %v1660_v10  ;;  %v1908_v10 = vpop.permute.xlu0 %1907 }
 0xd70   : > { %v1662_v41 = vadd.f32 %v2672_v34, %v1661_v37 }
 0xd72   : > { %v1666_v43 = vsel %vm1665_vm9, %v2672_v34, %v1662_v41 }
 0xd73   : > { %v1671_v44 = vsel %vm1668_vm11, %v1670_v42, %v1666_v43 }
 0xd74   : > { %v1673_v45 = vmul.f32 %v1671_v44, %v1653_v27  ;;  %v2003_v36 = vpop.permute.xlu1 %2002 }
 0xd76   : > { %v1678_v46 = vsel %vm580_vm0, %v1673_v45, 0.0 }
 0xd77   : > { %v1679_v47 = vrot.slane %v1678_v46, 4 }
 0xd79   : > { %v1680_v49 = vadd.f32 %v1679_v47, %v1678_v46 }
 0xd7b   : > { %v1681_v50 = vrot.slane %v1680_v49, 2 }
 0xd7d   : > { %v1682_v38 = vadd.f32 %v1681_v50, %v1680_v49 }
 0xd7f   : > { %v1683_v51 = vrot.slane %v1682_v38, 1 }
 0xd81   : > { %v1684_v52 = vadd.f32 %v1683_v51, %v1682_v38  ;;  %v2620_v38 = vld [vmem:[%s3579_s15 + $0xd] ss:$0 sm:$0xff] }
 0xd83   : > { %2394 = vmatmul.msk.f32.vlgmr.msrb.gmra.mxu3 %vm580_vm0, %v1684_v52 }
 0xd84   : > { %1873 = vmatpush.bf16.msrb.mxu3 %v2478_v30 }
 0xe06   : > { %v1705_v53 = vpop.f32.mrf.mxu3 }
 0xe07   : > { %v1708_v54 = vmul.f32 0.125, %v1705_v53  ;;  %v2621_v53 = vld [vmem:[%s3579_s15 + $0xe] ss:$0 sm:$0xff] }
 0xe09   : > { %v1709_v55 = vperm.slane %v1708_v54, 0 }
 0xe0b   : > { %v1710_v56 = vsub.f32 %v1673_v45, %v1709_v55 }
 0xe0d   : > { %v1711_v57 = vmul.f32 %v1710_v56, %v1710_v56 }
 0xe0f   : > { %v1712_v58 = vsel %vm580_vm0, %v1711_v57, 0.0  ;;  %v2482_v57 = vld [vmem:[%s3570_s6 + $0x18] sm:$0xff] }
 0xe10   : > { %v1713_v59 = vrot.slane %v1712_v58, 4  ;;  %1965 = vmatpush.bf16.msra.mxu1 %v2482_v57 }
 0xe12   : > { %v1714_v60 = vadd.f32 %v1713_v59, %v1712_v58  ;;  %v2481_v58 = vld [vmem:[%s3570_s6 + $0x10] sm:$0xff] }
 0xe14   : > { %v1715_v1 = vrot.slane %v1714_v60, 2  ;;  %1966 = vmatpush.bf16.msra.mxu1 %v2481_v58 }
 0xe16   : > { %v1716_v63 = vadd.f32 %v1715_v1, %v1714_v60  ;;  %v2480_v1 = vld [vmem:[%s3570_s6 + $0x8] sm:$0xff] }
 0xe17   : > { %1993 = vmatpush.bf16.msra.mxu2 %v2480_v1  ;;  %v2486_v1 = vld [vmem:[%s3570_s6 + $0x38] sm:$0xff] }
 0xe18   : > { %v1717_v2 = vrot.slane %v1716_v63, 1 }
 0xe1a   : > { %v1718_v3 = vadd.f32 %v1717_v2, %v1716_v63  ;;  %v2479_v2 = vld [vmem:[%s3570_s6] sm:$0xff] }
 0xe1b   : > { %1994 = vmatpush.bf16.msra.mxu2 %v2479_v2 }
 0xe1c   : > { %2395 = vmatmul.msk.f32.vlgmr.msra.gmra.mxu3 %vm580_vm0, %v1718_v3 }
 0xe9f   : > { %v1739_v5 = vpop.f32.mrf.mxu3 }
 0xea0   : > { %v1742_v6 = vmul.f32 0.125, %v1739_v5  ;;  %v2075_v5 = vpop.permute.xlu1 %2074 }
 0xea1   : > { %2087 = vmatpush.bf16.msrb.mxu1 %v2075_v5 }
 0xea2   : > { %v1743_v7 = vadd.f32 1e-05, %v1742_v6 }
 0xea4   : > { %2673 = vrsqrt.f32 %v1743_v7  ;;  %vm1750_vm13 = vweird.f32 %v1743_v7 }
 0xeaa   : > { %v2674_v8 = vpop.eup %2673 }
 0xeab   : > { %v1745_v20 = vmul.f32 %v2674_v8, %v1743_v7  ;;  %vm1751_vm12 = vweird.f32 %v2674_v8 }
 0xeac   : > { %vm1752_vm10 = vmor %vm1750_vm13, %vm1751_vm12 }
 0xead   : > { %v1746_v9 = vmul.f32 %v2674_v8, %v1745_v20 }
 0xeaf   : > { %v1747_v12 = vmul.f32 0.5, %v1746_v9 }
 0xeb1   : > { %v1748_v13 = vsub.f32 1.5, %v1747_v12 }
 0xeb3   : > { %v1749_v14 = vmul.f32 %v2674_v8, %v1748_v13  ;;  %v2484_v13 = vld [vmem:[%s3570_s6 + $0x28] sm:$0xff] }
 0xeb5   : > { %v1753_v15 = vsel %vm1752_vm10, %v2674_v8, %v1749_v14 }
 0xeb6   : > { %v1754_v16 = vperm.slane %v1753_v15, 0 }
 0xeb8   : > { %v1755_v18 = vmul.f32 %v1754_v16, %v1710_v56 }
 0xeba   : > { %v1758_v0 = vmul.f32 %v2616_v17, %v1755_v18  ;;  %v2483_v18 = vld [vmem:[%s3570_s6 + $0x20] sm:$0xff] }
 0xebc   : > { %v1761_v61 = vadd.f32 %v2617_v19, %v1758_v0 }
 0xebe   : > { %v1762_v21 = vpack.c.bf16 %v1761_v61, %v1761_v61 }
 0xec0   : > { %2404 = vmatmul.msk.bf16.vlgmr.msrb.gmra.mxu2 %vm580_vm0, %v1762_v21 }
 0xec1   : > { %2136 = vmatpush.bf16.msrb.mxu2 %v2486_v1 }
 0xf43   : > { %v1793_v23 = vpop.f32.mrf.mxu2 }
 0xf44   : > { %v1794_v24 = vadd.f32 %v2618_v22, %v1793_v23 }
 0xf46   : > { %v1797_v25 = vadd.f32 %v1794_v24, %v3381_v29 }
 0xf48   : > { %v3443_v26 = vadd.f32 %v1797_v25, %v3381_v29  ;;  %v2477_v29 = vld [vmem:[%s3568_s4] sm:$0xff] }
 0xf49   : > { %1874 = vmatpush.bf16.msrb.mxu3 %v2477_v29  ;;  %2000 = vrot.lane.b32.xlu0 %v2477_v29, %s2900_s20 }
 0xf4a   : > { %v1799_v27 = vsel %vm580_vm0, %v3443_v26, 0.0  ;;  %2072 = vrot.lane.b32.xlu1 %v2477_v29, %s2899_s19 }
 0xf4b   : > { %v1795_v28 = vpop.f32.mrf.mxu2  ;;  %1800 = vadd.xlane.f32.xlu2 %v1799_v27 }
 0xf4d   : > { %2015 = vmatpush.bf16.msra.mxu3 %v2003_v36 }
 0xf51   : > { %2006 = vrot.lane.b32.xlu0 %v3450_v31, %s2900_s20  ;;  %s2193_s20 = sshll.u32 %s2189_s24, 4  ;;  %s2194_s20 = int_to_ptr.hbm [resolvable:$true] %s2193_s20 }
 0xf52   : > { %s2829_s30 = sshra.s32 %s2194_s20, 4  ;;  %s2830_s30 = int_to_ptr.hbm [resolvable:$true] %s2829_s30 }
 0xf53   : > { %s2831_s21 = scalar_lea.hbm %s2830_s30, 8  ;;  %p2836_p3 = scmp.lt.s32.totalorder %s2830_s30, %s3580_s16 }
 0xf54   : > { %p2832_p0 = scmp.ne.s32.totalorder %s2830_s30, %s2831_s21 }
 0xf56   : > { %p2833_p1 = pnand %p2832_p0, %p3045_p5 }
 0xf58   : > { %p2834_p2 = pneg %p2833_p1 }
 0xfbb   : > { %v2001_v42 = vpop.permute.xlu0 %2000 }
 0xfbc   : > { %2016 = vmatpush.bf16.msra.mxu3 %v2001_v42  ;;  %v2073_v9 = vpop.permute.xlu1 %2072 }
 0xfbd   : > { %2088 = vmatpush.bf16.msrb.mxu1 %v2073_v9 }
 0xfbe   : > { %v1801_v32 = vpop.xlane.xlu2 %1800 }
 0xfbf   : > { %v1802_v33 = vmul.f32 %v1801_v32, %v3129_v11 }
 0xfc1   : > { %v1803_v40 = vsub.f32 %v3443_v26, %v1802_v33 }
 0xfc3   : > { %v1804_v62 = vmul.f32 %v1803_v40, %v1803_v40  ;;  %v2007_v16 = vpop.permute.xlu0 %2006 }
 0xfc5   : > { %v1805_v34 = vsel %vm580_vm0, %v1804_v62, 0.0 }
 0xfc6   : > { %1806 = vadd.xlane.f32.xlu2 %v1805_v34 }
 0xfde   : > { %1901 = vrot.lane.b32.xlu2 %v2477_v29, %s2898_s28 }
 0xfe6   : > { %2078 = vrot.lane.b32.xlu2 %v3450_v31, %s2899_s19  ;;  %s573_s19 = scalar_lea.vmem [#allocation10], %s2306_s10  ;;  %s2835_s10 = scalar_lea.hbm %s3580_s16, 16 }
 0xfe7   : > { %s2191_s25 = sshll.u32 %s573_s19, 4  ;;  %p2837_p4 = scmp.lt.s32.totalorder %s2835_s10, %s2831_s21  ;;  %s2192_s25 = int_to_ptr.vmem [resolvable:$true] %s2191_s25 }
 0xfe9   : > { %p2838_p7 = por %p2837_p4, %p2836_p3 }
 0xfeb   : > { %p2839_p8 = pnand %p2838_p7, %p2834_p2 }
0x1039   : > { %v1807_v37 = vpop.xlane.xlu2 %1806 }
0x103a   : > { %v1808_v39 = vmul.f32 %v1807_v37, %v3129_v11 }
0x103c   : > { %v1809_v41 = vadd.f32 1e-05, %v1808_v39 }
0x103e   : > { %2675 = vrsqrt.f32 %v1809_v41  ;;  %vm1816_vm15 = vweird.f32 %v1809_v41 }
0x1041   : > { %v1902_v43 = vpop.permute.xlu2 %1901 }
0x1042   : > { %1917 = vmatpush.bf16.msra.mxu0 %v1902_v43 }
0x1044   : > { %v2676_v44 = vpop.eup %2675 }
0x1045   : > { %v1811_v45 = vmul.f32 %v2676_v44, %v1809_v41  ;;  %vm1817_vm14 = vweird.f32 %v2676_v44 }
0x1046   : > { %vm1818_vm1 = vmor %vm1816_vm15, %vm1817_vm14  ;;  %2064 = vmatpush.bf16.msrb.mxu0 %v2484_v13 }
0x1047   : > { %v1812_v46 = vmul.f32 %v2676_v44, %v1811_v45 }
0x1049   : > { %v1813_v47 = vmul.f32 0.5, %v1812_v46 }
0x104a   : > { %2065 = vmatpush.bf16.msrb.mxu0 %v2483_v18 }
0x104b   : > { %v1814_v49 = vsub.f32 1.5, %v1813_v47 }
0x104d   : > { %v1815_v50 = vmul.f32 %v2676_v44, %v1814_v49 }
0x104f   : > { %v1819_v51 = vsel %vm1818_vm1, %v2676_v44, %v1815_v50 }
0x1050   : > { %v1820_v52 = vmul.f32 %v1819_v51, %v1803_v40 }
0x1052   : > { %v1823_v54 = vmul.f32 %v2620_v38, %v1820_v52 }
0x1054   : > { %v1826_v55 = vadd.f32 %v2621_v53, %v1823_v54 }
0x1056   : > { %v3477_v56 = vpack.c.bf16 %v1826_v55, %v1826_v55 }
0x1058   : > { %2413 = vmatmul.msk.bf16.vlgmr.msrb.gmra.mxu3 %vm580_vm0, %v3477_v56  ;;  %2415 = vmatmul.msk.bf16.vlgmr.msra.gmra.mxu0 %vm580_vm0, %v3477_v56 }
0x1068   : > { %2435 = vmatmul.msk.bf16.vlgmr.msra.gmra.mxu3 %vm580_vm0, %v3477_v56 }
0x10d5   : > { %v1919_v59 = vpop.f32.mrf.mxu0 }
0x10d6   : > { %v1920_v60 = vadd.f32 %v1919_v59, %v1908_v10 }
0x10d8   : > { %v2416_v63 = vmul.f32 -1.442695, %v1920_v60 }
0x10da   : > { %2677 = vpow2.f32 %v2416_v63 }
0x10db   : > { %v1876_v3 = vpop.f32.mrf.mxu3 }
0x10dc   : > { %v1877_v4 = vadd.f32 %v3450_v31, %v1876_v3  ;;  %v2079_v3 = vpop.permute.xlu2 %2078 }
0x10dd   : > { %v1921_v48 = vpop.f32.mrf.mxu0 }
0x10de   : > { %v2414_v6 = vmul.f32 -1.442695, %v1877_v4 }
0x10e0   : > { %v2678_v7 = vpop.eup %2677  ;;  %2679 = vpow2.f32 %v2414_v6 }
0x10e1   : > { %v1926_v8 = vadd.f32 1.0, %v2678_v7 }
0x10e3   : > { %2681 = vrcp.f32 %v1926_v8  ;;  %v1878_v20 = vpop.f32.mrf.mxu3  ;;  %v1938_v21 = vand.u32 2147483648, %v1926_v8  ;;  %v1936_v23 = vand.u32 2147483647, %v1926_v8  ;;  %vm1932_vm3 = vweird.f32 %v1926_v8 }
0x10e5   : > { %v1939_v30 = vor.u32 1.1754944e-38, %v1938_v21  ;;  %vm1937_vm5 = vcmp.eq.f32.partialorder %v1936_v23, 8.507059e+37 }
0x10e6   : > { %v2680_v12 = vpop.eup %2679 }
0x10e7   : > { %v1883_v14 = vadd.f32 1.0, %v2680_v12 }
0x10e9   : > { %v2682_v15 = vpop.eup %2681  ;;  %2683 = vrcp.f32 %v1883_v14  ;;  %v1895_v33 = vand.u32 2147483648, %v1883_v14  ;;  %v1893_v35 = vand.u32 2147483647, %v1883_v14  ;;  %vm1889_vm7 = vweird.f32 %v1883_v14 }
0x10ea   : > { %v1928_v17 = vmul.f32 %v2682_v15, %v1926_v8  ;;  %vm1933_vm2 = vweird.f32 %v2682_v15 }
0x10eb   : > { %v2018_v19 = vpop.f32.mrf.mxu3  ;;  %vm1934_vm4 = vmor %vm1932_vm3, %vm1933_vm2  ;;  %v1896_v39 = vor.u32 1.1754944e-38, %v1895_v33  ;;  %vm1894_vm9 = vcmp.eq.f32.partialorder %v1893_v35, 8.507059e+37 }
0x10ec   : > { %v1929_v0 = vsub.f32 1.0, %v1928_v17  ;;  %v2019_v61 = vadd.f32 %v2018_v19, %v2007_v16 }
0x10ee   : > { %v1930_v22 = vmul.f32 %v2682_v15, %v1929_v0  ;;  %v2436_v24 = vmul.f32 -1.442695, %v2019_v61 }
0x10ef   : > { %v2684_v25 = vpop.eup %2683 }
0x10f0   : > { %v1931_v27 = vadd.f32 %v2682_v15, %v1930_v22  ;;  %v1885_v28 = vmul.f32 %v2684_v25, %v1883_v14  ;;  %2685 = vpow2.f32 %v2436_v24  ;;  %vm1890_vm6 = vweird.f32 %v2684_v25 }
0x10f1   : > { %vm1891_vm8 = vmor %vm1889_vm7, %vm1890_vm6 }
0x10f2   : > { %v1935_v31 = vsel %vm1934_vm4, %v2682_v15, %v1931_v27  ;;  %v1886_v29 = vsub.f32 1.0, %v1885_v28  ;;  %v2622_v28 = vld [vmem:[%s3579_s15 + $0xf] ss:$0 sm:$0xff] }
0x10f3   : > { %v1940_v32 = vsel %vm1937_vm5, %v1939_v30, %v1935_v31  ;;  %v2020_v40 = vpop.f32.mrf.mxu3 }
0x10f4   : > { %v1942_v62 = vmul.f32 %v1940_v32, %v1920_v60  ;;  %v1887_v34 = vmul.f32 %v2684_v25, %v1886_v29 }
0x10f6   : > { %v2686_v10 = vpop.eup %2685  ;;  %v1943_v36 = vpack.c.bf16 %v1942_v62, %v1942_v62  ;;  %v1888_v37 = vadd.f32 %v2684_v25, %v1887_v34 }
0x10f7   : > { %v2025_v41 = vadd.f32 1.0, %v2686_v10 }
0x10f8   : > { %v1892_v42 = vsel %vm1891_vm8, %v2684_v25, %v1888_v37  ;;  %2425 = vmatmul.msk.bf16.vlgmr.msra.gmra.mxu1 %vm580_vm0, %v1943_v36 }
0x10f9   : > { %v1897_v43 = vsel %vm1894_vm9, %v1896_v39, %v1892_v42  ;;  %2687 = vrcp.f32 %v2025_v41  ;;  %v2037_v50 = vand.u32 2147483648, %v2025_v41  ;;  %v2035_v51 = vand.u32 2147483647, %v2025_v41 }
0x10fa   : > { %v1899_v44 = vmul.f32 %v1897_v43, %v1877_v4  ;;  %vm2031_vm12 = vweird.f32 %v2025_v41  ;;  %v2485_v4 = vld [vmem:[%s3570_s6 + $0x30] sm:$0xff] }
0x10fb   : > { %v2038_v53 = vor.u32 1.1754944e-38, %v2037_v50  ;;  %vm2036_vm10 = vcmp.eq.f32.partialorder %v2035_v51, 8.507059e+37  ;;  %2137 = vmatpush.bf16.msrb.mxu2 %v2485_v4 }
0x10fc   : > { %v1900_v45 = vpack.c.bf16 %v1899_v44, %v1899_v44 }
0x10fe   : > { %2434 = vmatmul.msk.bf16.vlgmr.msra.gmra.mxu2 %vm580_vm0, %v1900_v45 }
0x10ff   : > { %v2688_v46 = vpop.eup %2687 }
0x1100   : > { %v2027_v47 = vmul.f32 %v2688_v46, %v2025_v41  ;;  %vm2032_vm11 = vweird.f32 %v2688_v46 }
0x1101   : > { %vm2033_vm13 = vmor %vm2031_vm12, %vm2032_vm11 }
0x1102   : > { %v2028_v49 = vsub.f32 1.0, %v2027_v47 }
0x1104   : > { %v2029_v38 = vmul.f32 %v2688_v46, %v2028_v49  ;;  %v2624_v49 = vld [vmem:[%s3579_s15 + $0x11] ss:$0 sm:$0xff] }
0x1106   : > { %v2030_v52 = vadd.f32 %v2688_v46, %v2029_v38 }
0x1108   : > { %v2034_v54 = vsel %vm2033_vm13, %v2688_v46, %v2030_v52  ;;  %2446 = vmatmul.msk.bf16.vlgmr.msrb.gmra.mxu1 %vm580_vm0, %v3477_v56  ;;  %v2623_v46 = vld [vmem:[%s3579_s15 + $0x10] ss:$0 sm:$0xff] }
0x1109   : > { %v2039_v55 = vsel %vm2036_vm10, %v2038_v53, %v2034_v54 }
0x110a   : > { %v2041_v57 = vmul.f32 %v2039_v55, %v2019_v61 }
0x110c   : > { %v2042_v58 = vpack.c.bf16 %v2041_v57, %v2041_v57 }
0x110e   : > { %2445 = vmatmul.msk.bf16.vlgmr.msrb.gmra.mxu0 %vm580_vm0, %v2042_v58 }
0x1175   : > { %v1968_v59 = vpop.f32.mrf.mxu1 }
0x117d   : > { %v1970_v60 = vpop.f32.mrf.mxu1 }
0x1181   : > { %v1996_v63 = vpop.f32.mrf.mxu2 }
0x1182   : > { %v1997_v2 = vadd.f32 %v1996_v63, %v1968_v59 }
0x1185   : > { %v2090_v56 = vpop.f32.mrf.mxu1 }
0x1186   : > { %v2091_v48 = vadd.f32 %v2090_v56, %v2079_v3 }
0x1188   : > { %v2447_v5 = vmul.f32 -1.442695, %v2091_v48 }
0x1189   : > { %v1998_v6 = vpop.f32.mrf.mxu2 }
0x118a   : > { %2689 = vpow2.f32 %v2447_v5 }
0x118b   : > { %v2067_v7 = vpop.f32.mrf.mxu0 }
0x118c   : > { %v2071_v8 = vadd.f32 %v2067_v7, %v1997_v2 }
0x118d   : > { %v2092_v20 = vpop.f32.mrf.mxu1 }
0x1190   : > { %v2690_v9 = vpop.eup %2689 }
0x1191   : > { %v2097_v12 = vadd.f32 1.0, %v2690_v9 }
0x1193   : > { %2691 = vrcp.f32 %v2097_v12  ;;  %v2069_v13 = vpop.f32.mrf.mxu0  ;;  %v2109_v17 = vand.u32 2147483648, %v2097_v12  ;;  %v2107_v19 = vand.u32 2147483647, %v2097_v12  ;;  %vm2103_vm15 = vweird.f32 %v2097_v12 }
0x1195   : > { %v2110_v61 = vor.u32 1.1754944e-38, %v2109_v17  ;;  %vm2108_vm2 = vcmp.eq.f32.partialorder %v2107_v19, 8.507059e+37 }
0x1199   : > { %v2692_v14 = vpop.eup %2691 }
0x119a   : > { %v2099_v15 = vmul.f32 %v2692_v14, %v2097_v12  ;;  %vm2104_vm14 = vweird.f32 %v2692_v14 }
0x119b   : > { %vm2105_vm1 = vmor %vm2103_vm15, %vm2104_vm14 }
0x119c   : > { %v2100_v16 = vsub.f32 1.0, %v2099_v15 }
0x119e   : > { %v2101_v18 = vmul.f32 %v2692_v14, %v2100_v16 }
0x11a0   : > { %v2102_v0 = vadd.f32 %v2692_v14, %v2101_v18 }
0x11a2   : > { %v2106_v21 = vsel %vm2105_vm1, %v2692_v14, %v2102_v0 }
0x11a3   : > { %v2111_v22 = vsel %vm2108_vm2, %v2110_v61, %v2106_v21 }
0x11a4   : > { %v2113_v23 = vmul.f32 %v2111_v22, %v2091_v48 }
0x11a6   : > { %v2114_v24 = vpack.c.bf16 %v2113_v23, %v2113_v23 }
0x11a8   : > { %2456 = vmatmul.msk.bf16.vlgmr.msrb.gmra.mxu2 %vm580_vm0, %v2114_v24 }
0x122b   : > { %v2139_v25 = vpop.f32.mrf.mxu2 }
0x122c   : > { %v2143_v27 = vadd.f32 %v2139_v25, %v2071_v8 }
0x122e   : > { %v2144_v30 = vadd.f32 %v2143_v27, %v3443_v26 }
0x1230   : > { %v2147_v31 = vadd.f32 %v2622_v28, %v2144_v30 }
0x1232   : > { %v2148_v29 = vadd.f32 %v2147_v31, %v3443_v26 }
0x1233   : > { %v2141_v32 = vpop.f32.mrf.mxu2 }
0x1234   : > { %v2149_v33 = vsel %vm580_vm0, %v2148_v29, 0.0 }
0x1235   : > { %2150 = vadd.xlane.f32.xlu1 %v2149_v33 }
0x12a8   : > { %v2151_v40 = vpop.xlane.xlu1 %2150 }
0x12a9   : > { %v2152_v62 = vmul.f32 %v2151_v40, %v3129_v11 }
0x12ab   : > { %v2153_v34 = vsub.f32 %v2148_v29, %v2152_v62 }
0x12ad   : > { %v2154_v35 = vmul.f32 %v2153_v34, %v2153_v34 }
0x12af   : > { %v2155_v10 = vsel %vm580_vm0, %v2154_v35, 0.0 }
0x12b0   : > { %2156 = vadd.xlane.f32.xlu2 %v2155_v10 }
0x1323   : > { %v2157_v36 = vpop.xlane.xlu2 %2156 }
0x1324   : > { %v2158_v37 = vmul.f32 %v2157_v36, %v3129_v11 }
0x1326   : > { %v2159_v39 = vadd.f32 1e-05, %v2158_v37 }
0x1328   : > { %2693 = vrsqrt.f32 %v2159_v39  ;;  %vm2166_vm4 = vweird.f32 %v2159_v39 }
0x132e   : > { %v2694_v26 = vpop.eup %2693 }
0x132f   : > { %v2161_v41 = vmul.f32 %v2694_v26, %v2159_v39  ;;  %vm2167_vm3 = vweird.f32 %v2694_v26 }
0x1330   : > { %vm2168_vm5 = vmor %vm2166_vm4, %vm2167_vm3 }
0x1331   : > { %v2162_v42 = vmul.f32 %v2694_v26, %v2161_v41 }
0x1333   : > { %v2163_v43 = vmul.f32 0.5, %v2162_v42 }
0x1335   : > { %v2164_v44 = vsub.f32 1.5, %v2163_v43 }
0x1337   : > { %v2165_v45 = vmul.f32 %v2694_v26, %v2164_v44 }
0x1339   : > { %v2169_v11 = vsel %vm2168_vm5, %v2694_v26, %v2165_v45 }
0x133a   : > { %v2170_v47 = vmul.f32 %v2169_v11, %v2153_v34 }
0x133c   : > { %v2173_v50 = vmul.f32 %v2623_v46, %v2170_v47 }
0x133e   : > { %v2176_v38 = vadd.f32 %v2624_v49, %v2173_v50 }
0x1340   : > { %2177 = vst.msk [vmem:[%s573_s19] sm:$0xff] %vm580_vm0, %v2176_v38 }
0x1341   : > { %2842 = shalt.err (!%p2839_p8)
}
0x1342   : > { %2503 = dma.vmem_to_hbm [thread:$0]  (%p3045_p5), %s2192_s25, 128, %s2194_s20, %s2179_s0  }
0x1343 PF: > { %s3609_s5 = sld [smem:[#allocation17_spill]] }
0x1344   : > { %s3610_s23 = sld [smem:[#allocation15_spill]] }
0x1349   : > { %p2530_p9 = scmp.ge.s32.totalorder %s3609_s5, 2 }
0x134a   : > { %s2205_s27 = sand.u32 1, %s3610_s23  }
0x134b   : > { %p2519_p10 = pnand %p2530_p9, %p3049_p6  ;;  %s2206_s28 = scalar_lea.sflag [#allocation4], %s2205_s27 }
0x134d   : > { %p2520_p11 = pneg %p2519_p10 }
0x134f   : > { %2872 = dma.done.wait (%p2520_p11), %s2206_s28, 128  }
0x1350   : > { %2874 = vsyncadd (%p2520_p11), %s2206_s28, 4294967168  ;;  %s3612_s24 = sld [smem:[#allocation18_spill]]  ;;  %s3615_s21 = smov %s2881_s22 }
0x1351   : > { %s3613_s19 = sld [smem:[#allocation16_spill]] }
0x1352   : > { %s3614_s23 = sld [smem:[#allocation19_spill]] }
0x1356   : > { %p29_p12 = scmp.ge.s32.totalorder %s3612_s24, 4  }
0x1357   : > { %s3616_s22 = smov %s3613_s19 }
0x1358   :  { %31 = sbr.rel (!%p29_p12) target bundleno = 11 (0xb), region = 136 }
0x135d   :  { %2212 = vsyncpa [#allocation3], 1 }
0x135e   :  { %2214 = vsyncpa [#allocation3 + $0x1], 1 }
0x135f   :  { %2215 = vsyncpa [#allocation6], 1 }
0x1360   :  { %2216 = vsyncpa [#allocation9], 1 }
0x1361   :  { %2217 = vsyncpa [#allocation4], 1 }
0x1362   :  { %2219 = vsyncpa [#allocation4 + $0x1], 1 }

</bundles_post_ra>
